<compile_context>
chip_gen: v5e
topology: v5e:2x2
jax: 0.10.0
libtpu: 0.0.40
codegen_flags: <defaults>
</compile_context>

<pallas_src>
import functools
import math

import jax
import jax.numpy as jnp
from jax import lax
from jax.experimental import pallas as pl
from jax.experimental.pallas import tpu as pltpu


def _mhsa_kernel(x_ref, mask_ref,
                 wqT_ref, bq_ref, wkvT_ref, bkv_ref, woT_ref, bo_ref,
                 gamma_ref, beta_ref,
                 out_ref,
                 kv_scratch, ctx_scratch,
                 *, n_heads, head_dim, heads_per_group, eps, exp_dtype):
    # x_ref     : (1, S, D) full sequence (f32)        mask_ref: (1, 1, S) additive (f32)
    # wqT_ref   : (D, D)  bf16 (in,out), 1/sqrt(hd) folded in      bq_ref : (1, D)  f32 (scaled)
    # wkvT_ref  : (D, 2D) bf16 [WK^T | WV^T]                       bkv_ref: (1, 2D) f32
    # woT_ref   : (D, D)  bf16                                     bo_ref : (1, D)  f32
    # kv_scratch: (S, 2D) bf16 VMEM (persists across query tiles of one batch element)
    # ctx_scratch: (tq, D) bf16 VMEM
    qi = pl.program_id(1)
    S = x_ref.shape[1]
    tq = out_ref.shape[1]
    D = n_heads * head_dim

    # Fused K/V projection: only on the first query tile of each batch element; later
    # query tiles reuse the VMEM-resident result (qi must stay innermost + "arbitrary").
    @pl.when(qi == 0)
    def _():
        x_full = x_ref[0].astype(jnp.bfloat16)                                  # (S, D)
        kv = jnp.dot(x_full, wkvT_ref[...],
                     preferred_element_type=jnp.float32) + bkv_ref[...]         # (S, 2D)
        kv_scratch[...] = kv.astype(jnp.bfloat16)                               # one lane-dense store

    # Query tile sliced from the resident full-sequence block (no duplicate x input).
    q_start = pl.multiple_of(qi * tq, tq)
    x_q_f32 = x_ref[0, pl.ds(q_start, tq), :].astype(jnp.float32)               # residual / LN path
    x_q = x_q_f32.astype(jnp.bfloat16)

    # Q projection; attention scale already folded into WQ / bQ on the host.
    q = (jnp.dot(x_q, wqT_ref[...], preferred_element_type=jnp.float32)
         + bq_ref[...]).astype(jnp.bfloat16)                                    # (tq, D)

    # Hoisted mask broadcast: one broadcast instead of one per head.
    mask2d = jnp.broadcast_to(mask_ref[0].astype(jnp.float32), (tq, S))         # (tq, S)

    # Per-head attention, grouped so each ctx_scratch store is lane-dense (>=128 lanes
    # or all of D when D < 128).
    # TODO(synk): if bundle dumps show vreg/VMEM spills at large tq*S, switch this to a
    # lax.fori_loop over head groups to bound live ranges.
    for g0 in range(0, n_heads, heads_per_group):
        ctx_parts = []
        for h in range(g0, g0 + heads_per_group):
            sl = slice(h * head_dim, (h + 1) * head_dim)
            qh = q[:, sl]                                                        # (tq, hd) bf16
            kh = kv_scratch[:, sl]                                               # (S,  hd) bf16
            vh = kv_scratch[:, D + h * head_dim:D + (h + 1) * head_dim]          # (S,  hd) bf16
            # q @ k^T without materializing a transpose (NT dot_general), f32 accumulate.
            scores = lax.dot_general(qh, kh, (((1,), (1,)), ((), ())),
                                     preferred_element_type=jnp.float32)         # (tq, S)
            scores = scores + mask2d
            m = jnp.max(scores, axis=-1, keepdims=True)
            e = jnp.exp((scores - m).astype(exp_dtype))                          # bf16 on v6e/v7x
            denom = jnp.sum(e.astype(jnp.float32), axis=-1, keepdims=True)       # f32 sum
            inv = pl.reciprocal(denom, approx=True)                              # EUP
            probs = (e * inv.astype(e.dtype)).astype(jnp.bfloat16)
            # TODO(synk): attn_dropout skipped (eval-mode identity).
            ctx_parts.append(
                jnp.dot(probs, vh, preferred_element_type=jnp.float32)
                .astype(jnp.bfloat16))
        ctx_blk = ctx_parts[0] if len(ctx_parts) == 1 else jnp.concatenate(ctx_parts, axis=-1)
        ctx_scratch[:, g0 * head_dim:(g0 + heads_per_group) * head_dim] = ctx_blk

    # Output projection on the merged heads (contraction dim D -> well-shaped for MXU).
    proj = jnp.dot(ctx_scratch[...], woT_ref[...],
                   preferred_element_type=jnp.float32) + bo_ref[...]
    # TODO(synk): out_dropout skipped (eval-mode identity).

    # Residual + LayerNorm in f32.
    y = x_q_f32 + proj
    mean = jnp.mean(y, axis=-1, keepdims=True)
    var = jnp.mean(jnp.square(y - mean), axis=-1, keepdims=True)
    normed = (y - mean) * lax.rsqrt(var + eps)
    out_ref[0] = (normed * gamma_ref[...] + beta_ref[...]).astype(out_ref.dtype)


def _tpu_tuning():
    """Per-generation knobs: VMEM budget, query-tile cap, bf16 EUP exp path."""
    kind = ""
    try:
        kind = jax.devices()[0].device_kind.lower()
    except Exception:
        pass
    if "v7" in kind:   # 64 MiB physical VMEM per TC
        return dict(vmem_limit=48 * 1024 * 1024, tq_cap=256, bf16_exp=True)
    if "v6" in kind:   # 128 MiB VMEM, bf16 EUP
        return dict(vmem_limit=96 * 1024 * 1024, tq_cap=512, bf16_exp=True)
    if "v5" in kind:   # 128 MiB VMEM, no bf16 EUP, 128x128 MXU
        return dict(vmem_limit=96 * 1024 * 1024, tq_cap=128, bf16_exp=False)
    return dict(vmem_limit=64 * 1024 * 1024, tq_cap=256, bf16_exp=False)


def _pick_q_tile(S, cap):
    """Largest multiple-of-8 divisor of S <= cap (also keeps the (tq,S) f32 score tile
    bounded); falls back to the full sequence."""
    cap = min(cap, max(8, (4 * 1024 * 1024) // max(4 * S, 1)))
    cap = max(8, min(cap, S))
    start = cap - (cap % 8) if cap % 8 else cap
    for cand in range(start, 7, -8):
        if S % cand == 0:
            return cand
    # TODO(synk): S with no multiple-of-8 divisor falls back to tq = S (may blow the
    # VMEM budget for large, awkward S, especially on v7x).
    return S


def _heads_per_group(n_heads, head_dim):
    """Smallest divisor of n_heads whose group width reaches 128 lanes (else all heads)."""
    if head_dim >= 128:
        return 1
    for g in range(1, n_heads + 1):
        if n_heads % g == 0 and g * head_dim >= 128:
            return g
    return n_heads


def multi_head_self_attention(x, mask, params, *, n_heads, layer_norm_eps=1e-12):
    """x: (B, S, D) float; mask: (B, 1, S) or (1, S) additive float. Returns (B, S, D)."""
    B, S, D = x.shape
    assert D % n_heads == 0
    head_dim = D // n_heads

    tune = _tpu_tuning()
    tq = _pick_q_tile(S, tune["tq_cap"])
    num_q = S // tq if S % tq == 0 else 1
    if S % tq != 0:
        tq = S
    hpg = _heads_per_group(n_heads, head_dim)

    if mask.ndim == 2:                       # (1, S) -> (B, 1, S)
        mask = jnp.broadcast_to(mask[None], (B, 1, S))
    mask_f = jnp.broadcast_to(mask, (B, 1, S)).astype(jnp.float32)

    wq, bq, wk, bk, wv, bv, wo, bo, gamma, beta = params

    # Host-side prep: (in, out) layout, fold 1/sqrt(head_dim) into WQ/bQ, fuse WK|WV,
    # bf16 matmul operands; biases / LN affine stay f32.
    inv_scale = 1.0 / math.sqrt(head_dim)
    wqT = (wq.T * inv_scale).astype(jnp.bfloat16)
    wkvT = jnp.concatenate([wk.T, wv.T], axis=1).astype(jnp.bfloat16)    # (D, 2D)
    woT = wo.T.astype(jnp.bfloat16)
    bq_s = (bq * inv_scale).astype(jnp.float32)
    bkv_f = jnp.concatenate([bk, bv], axis=1).astype(jnp.float32)        # (1, 2D)
    bo_f = bo.astype(jnp.float32)
    gamma_f = gamma.astype(jnp.float32)
    beta_f = beta.astype(jnp.float32)

    kernel = functools.partial(
        _mhsa_kernel, n_heads=n_heads, head_dim=head_dim, heads_per_group=hpg,
        eps=layer_norm_eps,
        exp_dtype=jnp.bfloat16 if tune["bf16_exp"] else jnp.float32)

    def build(single_buffer_consts):
        # Constant-index blocks (weights/biases/LN affine) are DMA'd once; single-buffer
        # them to reclaim VMEM. x / mask / out depend on the batch index -> default.
        if single_buffer_consts:
            def const_spec(shape):
                return pl.BlockSpec(shape, lambda b, i: (0, 0), pipeline_mode=pl.Buffered(1))
        else:
            def const_spec(shape):
                return pl.BlockSpec(shape, lambda b, i: (0, 0))

        return pl.pallas_call(
            kernel,
            out_shape=jax.ShapeDtypeStruct((B, S, D), x.dtype),
            grid_spec=pltpu.PrefetchScalarGridSpec(
                num_scalar_prefetch=0,
                grid=(B, num_q),
                in_specs=[
                    pl.BlockSpec((1, S, D), lambda b, i: (b, 0, 0)),   # x (full sequence)
                    pl.BlockSpec((1, 1, S), lambda b, i: (b, 0, 0)),   # additive mask
                    const_spec((D, D)), const_spec((1, D)),            # WQ^T (scaled), bQ (scaled)
                    const_spec((D, 2 * D)), const_spec((1, 2 * D)),    # [WK|WV]^T, [bK|bV]
                    const_spec((D, D)), const_spec((1, D)),            # WO^T, bO
                    const_spec((1, D)), const_spec((1, D)),            # gamma, beta
                ],
                out_specs=pl.BlockSpec((1, tq, D), lambda b, i: (b, i, 0)),
                scratch_shapes=[
                    pltpu.VMEM((S, 2 * D), jnp.bfloat16),   # fused K|V cache per batch element
                    pltpu.VMEM((tq, D), jnp.bfloat16),      # merged-head context (lane-dense stores)
                ],
            ),
            compiler_params=pltpu.CompilerParams(
                # Batch axis shards across TensorCores; query-tile axis MUST stay
                # "arbitrary" (sequential) because the K/V scratch is filled at qi == 0.
                dimension_semantics=("parallel", "arbitrary"),
                vmem_limit_bytes=tune["vmem_limit"],
            ),
        )

    args = (x, mask_f, wqT, bq_s, wkvT, bkv_f, woT, bo_f, gamma_f, beta_f)
    try:
        return build(True)(*args)
    except Exception:
        # TODO(synk): pl.Buffered(1) rejected by this JAX build; fall back to default buffering.
        return build(False)(*args)


def init_params(key, emb_dim):
    """Deterministic init mimicking nn.Linear default (uniform +/- 1/sqrt(fan_in))."""
    ks = jax.random.split(key, 8)
    bound = 1.0 / math.sqrt(emb_dim)
    u = lambda k, shape: jax.random.uniform(k, shape, jnp.float32, -bound, bound)
    wq, bq = u(ks[0], (emb_dim, emb_dim)), u(ks[1], (1, emb_dim))
    wk, bk = u(ks[2], (emb_dim, emb_dim)), u(ks[3], (1, emb_dim))
    wv, bv = u(ks[4], (emb_dim, emb_dim)), u(ks[5], (1, emb_dim))
    wo, bo = u(ks[6], (emb_dim, emb_dim)), u(ks[7], (1, emb_dim))
    gamma = jnp.ones((1, emb_dim), jnp.float32)
    beta = jnp.zeros((1, emb_dim), jnp.float32)
    return (wq, bq, wk, bk, wv, bv, wo, bo, gamma, beta)


def _reference(x, mask, params, n_heads, eps=1e-12):
    """Pure-JAX f32 reference mirroring the PyTorch forward (eval mode)."""
    wq, bq, wk, bk, wv, bv, wo, bo, gamma, beta = params
    B, S, D = x.shape
    hd = D // n_heads

    def split_heads(t):  # (B,S,D) -> (B,H,S,hd)
        return t.reshape(B, S, n_heads, hd).transpose(0, 2, 1, 3)

    q = split_heads(x @ wq.T + bq)
    k = split_heads(x @ wk.T + bk)
    v = split_heads(x @ wv.T + bv)
    scores = jnp.einsum("bhqd,bhkd->bhqk", q, k) / math.sqrt(hd)
    scores = scores + mask[:, :, None, :]
    probs = jax.nn.softmax(scores, axis=-1)
    ctx = jnp.einsum("bhqk,bhkd->bhqd", probs, v)
    ctx = ctx.transpose(0, 2, 1, 3).reshape(B, S, D)
    out = ctx @ wo.T + bo
    y = x + out
    mean = y.mean(-1, keepdims=True)
    var = ((y - mean) ** 2).mean(-1, keepdims=True)
    return (y - mean) / jnp.sqrt(var + eps) * gamma + beta


if __name__ == "__main__":
    B, S, D, H = 2, 8, 32, 4

    key = jax.random.PRNGKey(0)
    kx, kparam = jax.random.split(key, 2)

    x = jax.random.normal(kx, (B, S, D), jnp.float32)
    # additive mask: 0 = attend, -1e4 = masked (mask the last two keys of batch 1)
    keep = jnp.ones((B, 1, S), jnp.float32).at[1, 0, -2:].set(0.0)
    mask = (1.0 - keep) * (-1e4)

    params = init_params(kparam, D)

    out = multi_head_self_attention(x, mask, params, n_heads=H)
    out = jax.block_until_ready(out)

    ref = _reference(x, mask, params, H)
    max_err = float(jnp.max(jnp.abs(out - ref)))
    # bf16 MXU inputs + bf16 exp (v6e/v7x) + approx reciprocal => loosened tolerance.
    assert jnp.allclose(out, ref, atol=5e-2, rtol=5e-2), f"mismatch vs reference (max abs err {max_err})"

    print("KERNEL_OK")
</pallas_src>

<mosaic_0001>
module attributes {stable_mosaic.version = 11 : i64} {
  func.func @_mhsa_kernel(%arg0: i32, %arg1: i32, %arg2: memref<1x8x32xf32, #tpu.memory_space<vmem>>, %arg3: memref<1x1x8xf32, #tpu.memory_space<vmem>>, %arg4: memref<32x32xbf16, #tpu.memory_space<vmem>>, %arg5: memref<1x32xf32, #tpu.memory_space<vmem>>, %arg6: memref<32x64xbf16, #tpu.memory_space<vmem>>, %arg7: memref<1x64xf32, #tpu.memory_space<vmem>>, %arg8: memref<32x32xbf16, #tpu.memory_space<vmem>>, %arg9: memref<1x32xf32, #tpu.memory_space<vmem>>, %arg10: memref<1x32xf32, #tpu.memory_space<vmem>>, %arg11: memref<1x32xf32, #tpu.memory_space<vmem>>, %arg12: memref<1x8x32xf32, #tpu.memory_space<vmem>>, %arg13: memref<8x64xbf16, #tpu.memory_space<vmem>>, %arg14: memref<8x32xbf16, #tpu.memory_space<vmem>>) attributes {dimension_semantics = [#tpu.dimension_semantics<parallel>, #tpu.dimension_semantics<arbitrary>], iteration_bounds = array<i64: 2, 1>, scalar_prefetch = 0 : i64, scratch_operands = 2 : i64, tpu.core_type = #tpu.core_type<tc>, window_params = [{transform_indices = @transform_0, window_bounds = array<i64: 1, 8, 32>}, {transform_indices = @transform_1, window_bounds = array<i64: 1, 1, 8>}, {pipeline_mode = #tpu.pipeline_mode<synchronous>, transform_indices = @transform_2, window_bounds = array<i64: 32, 32>}, {pipeline_mode = #tpu.pipeline_mode<synchronous>, transform_indices = @transform_3, window_bounds = array<i64: 1, 32>}, {pipeline_mode = #tpu.pipeline_mode<synchronous>, transform_indices = @transform_4, window_bounds = array<i64: 32, 64>}, {pipeline_mode = #tpu.pipeline_mode<synchronous>, transform_indices = @transform_5, window_bounds = array<i64: 1, 64>}, {pipeline_mode = #tpu.pipeline_mode<synchronous>, transform_indices = @transform_6, window_bounds = array<i64: 32, 32>}, {pipeline_mode = #tpu.pipeline_mode<synchronous>, transform_indices = @transform_7, window_bounds = array<i64: 1, 32>}, {pipeline_mode = #tpu.pipeline_mode<synchronous>, transform_indices = @transform_8, window_bounds = array<i64: 1, 32>}, {pipeline_mode = #tpu.pipeline_mode<synchronous>, transform_indices = @transform_9, window_bounds = array<i64: 1, 32>}, {transform_indices = @transform_10, window_bounds = array<i64: 1, 8, 32>}]} {
    %c0_i32 = arith.constant 0 : i32
    %0 = arith.cmpi eq, %arg1, %c0_i32 : i32
    %1 = arith.extui %0 : i1 to i32
    %c0_i32_0 = arith.constant 0 : i32
    %2 = arith.cmpi ne, %1, %c0_i32_0 : i32
    scf.if %2 {
      %c0_55 = arith.constant 0 : index
      %c0_56 = arith.constant 0 : index
      %c0_57 = arith.constant 0 : index
      %127 = vector.load %arg2[%c0_55, %c0_56, %c0_57] : memref<1x8x32xf32, #tpu.memory_space<vmem>>, vector<1x8x32xf32>
      %128 = vector.shape_cast %127 : vector<1x8x32xf32> to vector<8x32xf32>
      %129 = arith.truncf %128 : vector<8x32xf32> to vector<8x32xbf16>
      %c0_58 = arith.constant 0 : index
      %c0_59 = arith.constant 0 : index
      %130 = vector.load %arg6[%c0_58, %c0_59] : memref<32x64xbf16, #tpu.memory_space<vmem>>, vector<32x64xbf16>
      %cst_60 = arith.constant dense<0.000000e+00> : vector<8x64xf32>
      %131 = tpu.matmul %129, %130, %cst_60 {dimension_numbers = #tpu.dot_dimension_numbers<[1], [0], [0], [1], [0, 0, 1, 1], [], []>} : vector<8x32xbf16>, vector<32x64xbf16>, vector<8x64xf32> -> vector<8x64xf32>
      %c0_61 = arith.constant 0 : index
      %c0_62 = arith.constant 0 : index
      %132 = vector.load %arg7[%c0_61, %c0_62] : memref<1x64xf32, #tpu.memory_space<vmem>>, vector<1x64xf32>
      %133 = vector.broadcast %132 : vector<1x64xf32> to vector<8x64xf32>
      %134 = arith.addf %131, %133 : vector<8x64xf32>
      %135 = arith.truncf %134 : vector<8x64xf32> to vector<8x64xbf16>
      %c0_63 = arith.constant 0 : index
      %c0_64 = arith.constant 0 : index
      %136 = vector.load %arg13[%c0_63, %c0_64] : memref<8x64xbf16, #tpu.memory_space<vmem>>, vector<8x64xbf16>
      tpu.vector_store %arg13[%c0_63, %c0_64], %135 {strides = array<i32>} : memref<8x64xbf16, #tpu.memory_space<vmem>>, vector<8x64xbf16>,
    } else {
    }
    %c8_i32 = arith.constant 8 : i32
    %3 = arith.muli %arg1, %c8_i32 : i32
    %4 = tpu.assume_multiple %3, 8 : i32
    %c0 = arith.constant 0 : index
    %5 = arith.index_cast %4 : i32 to index
    %c0_1 = arith.constant 0 : index
    %6 = vector.load %arg2[%c0, %5, %c0_1] : memref<1x8x32xf32, #tpu.memory_space<vmem>>, vector<1x8x32xf32>
    %7 = vector.shape_cast %6 : vector<1x8x32xf32> to vector<8x32xf32>
    %8 = arith.truncf %7 : vector<8x32xf32> to vector<8x32xbf16>
    %c0_2 = arith.constant 0 : index
    %c0_3 = arith.constant 0 : index
    %9 = vector.load %arg4[%c0_2, %c0_3] : memref<32x32xbf16, #tpu.memory_space<vmem>>, vector<32x32xbf16>
    %cst = arith.constant dense<0.000000e+00> : vector<8x32xf32>
    %10 = tpu.matmul %8, %9, %cst {dimension_numbers = #tpu.dot_dimension_numbers<[1], [0], [0], [1], [0, 0, 1, 1], [], []>} : vector<8x32xbf16>, vector<32x32xbf16>, vector<8x32xf32> -> vector<8x32xf32>
    %c0_4 = arith.constant 0 : index
    %c0_5 = arith.constant 0 : index
    %11 = vector.load %arg5[%c0_4, %c0_5] : memref<1x32xf32, #tpu.memory_space<vmem>>, vector<1x32xf32>
    %12 = vector.broadcast %11 : vector<1x32xf32> to vector<8x32xf32>
    %13 = arith.addf %10, %12 : vector<8x32xf32>
    %14 = arith.truncf %13 : vector<8x32xf32> to vector<8x32xbf16>
    %c0_6 = arith.constant 0 : index
    %c0_7 = arith.constant 0 : index
    %c0_8 = arith.constant 0 : index
    %15 = vector.load %arg3[%c0_6, %c0_7, %c0_8] : memref<1x1x8xf32, #tpu.memory_space<vmem>>, vector<1x1x8xf32>
    %16 = vector.shape_cast %15 : vector<1x1x8xf32> to vector<1x8xf32>
    %17 = vector.shape_cast %16 : vector<1x8xf32> to vector<1x8xf32>
    %18 = vector.broadcast %17 : vector<1x8xf32> to vector<8x8xf32>
    %19 = vector.extract_strided_slice %14 {offsets = [0, 0], sizes = [8, 8], strides = [1, 1]} : vector<8x32xbf16> to vector<8x8xbf16>
    %c0_9 = arith.constant 0 : index
    %c0_10 = arith.constant 0 : index
    %20 = vector.load %arg13[%c0_9, %c0_10] : memref<8x64xbf16, #tpu.memory_space<vmem>>, vector<8x8xbf16>
    %c0_11 = arith.constant 0 : index
    %c32 = arith.constant 32 : index
    %21 = vector.load %arg13[%c0_11, %c32] : memref<8x64xbf16, #tpu.memory_space<vmem>>, vector<8x8xbf16>
    %cst_12 = arith.constant dense<0.000000e+00> : vector<8x8xf32>
    %22 = tpu.matmul %19, %20, %cst_12 {dimension_numbers = #tpu.dot_dimension_numbers<[1], [1], [0], [0], [0, 0, 1, 0], [], []>} : vector<8x8xbf16>, vector<8x8xbf16>, vector<8x8xf32> -> vector<8x8xf32>
    %23 = arith.addf %22, %18 : vector<8x8xf32>
    %cst_13 = arith.constant dense<0xFF800000> : vector<8xf32>
    %24 = vector.multi_reduction <maximumf>, %23, %cst_13 [1] : vector<8x8xf32> to vector<8xf32>
    %25 = vector.shape_cast %24 : vector<8xf32> to vector<8x1xf32>
    %26 = vector.broadcast %25 : vector<8x1xf32> to vector<8x8xf32>
    %27 = arith.subf %23, %26 : vector<8x8xf32>
    %28 = math.exp %27 : vector<8x8xf32>
    %cst_14 = arith.constant dense<0.000000e+00> : vector<8xf32>
    %29 = vector.multi_reduction <add>, %28, %cst_14 [1] : vector<8x8xf32> to vector<8xf32>
    %30 = vector.shape_cast %29 : vector<8xf32> to vector<8x1xf32>
    %31 = tpu.reciprocal %30 {approx = true} : vector<8x1xf32> -> vector<8x1xf32>
    %32 = vector.broadcast %31 : vector<8x1xf32> to vector<8x8xf32>
    %33 = arith.mulf %28, %32 : vector<8x8xf32>
    %34 = arith.truncf %33 : vector<8x8xf32> to vector<8x8xbf16>
    %cst_15 = arith.constant dense<0.000000e+00> : vector<8x8xf32>
    %35 = tpu.matmul %34, %21, %cst_15 {dimension_numbers = #tpu.dot_dimension_numbers<[1], [0], [0], [1], [0, 0, 1, 1], [], []>} : vector<8x8xbf16>, vector<8x8xbf16>, vector<8x8xf32> -> vector<8x8xf32>
    %36 = arith.truncf %35 : vector<8x8xf32> to vector<8x8xbf16>
    %37 = vector.extract_strided_slice %14 {offsets = [0, 8], sizes = [8, 8], strides = [1, 1]} : vector<8x32xbf16> to vector<8x8xbf16>
    %c0_16 = arith.constant 0 : index
    %c8 = arith.constant 8 : index
    %38 = vector.load %arg13[%c0_16, %c8] : memref<8x64xbf16, #tpu.memory_space<vmem>>, vector<8x8xbf16>
    %c0_17 = arith.constant 0 : index
    %c40 = arith.constant 40 : index
    %39 = vector.load %arg13[%c0_17, %c40] : memref<8x64xbf16, #tpu.memory_space<vmem>>, vector<8x8xbf16>
    %cst_18 = arith.constant dense<0.000000e+00> : vector<8x8xf32>
    %40 = tpu.matmul %37, %38, %cst_18 {dimension_numbers = #tpu.dot_dimension_numbers<[1], [1], [0], [0], [0, 0, 1, 0], [], []>} : vector<8x8xbf16>, vector<8x8xbf16>, vector<8x8xf32> -> vector<8x8xf32>
    %41 = arith.addf %40, %18 : vector<8x8xf32>
    %cst_19 = arith.constant dense<0xFF800000> : vector<8xf32>
    %42 = vector.multi_reduction <maximumf>, %41, %cst_19 [1] : vector<8x8xf32> to vector<8xf32>
    %43 = vector.shape_cast %42 : vector<8xf32> to vector<8x1xf32>
    %44 = vector.broadcast %43 : vector<8x1xf32> to vector<8x8xf32>
    %45 = arith.subf %41, %44 : vector<8x8xf32>
    %46 = math.exp %45 : vector<8x8xf32>
    %cst_20 = arith.constant dense<0.000000e+00> : vector<8xf32>
    %47 = vector.multi_reduction <add>, %46, %cst_20 [1] : vector<8x8xf32> to vector<8xf32>
    %48 = vector.shape_cast %47 : vector<8xf32> to vector<8x1xf32>
    %49 = tpu.reciprocal %48 {approx = true} : vector<8x1xf32> -> vector<8x1xf32>
    %50 = vector.broadcast %49 : vector<8x1xf32> to vector<8x8xf32>
    %51 = arith.mulf %46, %50 : vector<8x8xf32>
    %52 = arith.truncf %51 : vector<8x8xf32> to vector<8x8xbf16>
    %cst_21 = arith.constant dense<0.000000e+00> : vector<8x8xf32>
    %53 = tpu.matmul %52, %39, %cst_21 {dimension_numbers = #tpu.dot_dimension_numbers<[1], [0], [0], [1], [0, 0, 1, 1], [], []>} : vector<8x8xbf16>, vector<8x8xbf16>, vector<8x8xf32> -> vector<8x8xf32>
    %54 = arith.truncf %53 : vector<8x8xf32> to vector<8x8xbf16>
    %55 = vector.extract_strided_slice %14 {offsets = [0, 16], sizes = [8, 8], strides = [1, 1]} : vector<8x32xbf16> to vector<8x8xbf16>
    %c0_22 = arith.constant 0 : index
    %c16 = arith.constant 16 : index
    %56 = vector.load %arg13[%c0_22, %c16] : memref<8x64xbf16, #tpu.memory_space<vmem>>, vector<8x8xbf16>
    %c0_23 = arith.constant 0 : index
    %c48 = arith.constant 48 : index
    %57 = vector.load %arg13[%c0_23, %c48] : memref<8x64xbf16, #tpu.memory_space<vmem>>, vector<8x8xbf16>
    %cst_24 = arith.constant dense<0.000000e+00> : vector<8x8xf32>
    %58 = tpu.matmul %55, %56, %cst_24 {dimension_numbers = #tpu.dot_dimension_numbers<[1], [1], [0], [0], [0, 0, 1, 0], [], []>} : vector<8x8xbf16>, vector<8x8xbf16>, vector<8x8xf32> -> vector<8x8xf32>
    %59 = arith.addf %58, %18 : vector<8x8xf32>
    %cst_25 = arith.constant dense<0xFF800000> : vector<8xf32>
    %60 = vector.multi_reduction <maximumf>, %59, %cst_25 [1] : vector<8x8xf32> to vector<8xf32>
    %61 = vector.shape_cast %60 : vector<8xf32> to vector<8x1xf32>
    %62 = vector.broadcast %61 : vector<8x1xf32> to vector<8x8xf32>
    %63 = arith.subf %59, %62 : vector<8x8xf32>
    %64 = math.exp %63 : vector<8x8xf32>
    %cst_26 = arith.constant dense<0.000000e+00> : vector<8xf32>
    %65 = vector.multi_reduction <add>, %64, %cst_26 [1] : vector<8x8xf32> to vector<8xf32>
    %66 = vector.shape_cast %65 : vector<8xf32> to vector<8x1xf32>
    %67 = tpu.reciprocal %66 {approx = true} : vector<8x1xf32> -> vector<8x1xf32>
    %68 = vector.broadcast %67 : vector<8x1xf32> to vector<8x8xf32>
    %69 = arith.mulf %64, %68 : vector<8x8xf32>
    %70 = arith.truncf %69 : vector<8x8xf32> to vector<8x8xbf16>
    %cst_27 = arith.constant dense<0.000000e+00> : vector<8x8xf32>
    %71 = tpu.matmul %70, %57, %cst_27 {dimension_numbers = #tpu.dot_dimension_numbers<[1], [0], [0], [1], [0, 0, 1, 1], [], []>} : vector<8x8xbf16>, vector<8x8xbf16>, vector<8x8xf32> -> vector<8x8xf32>
    %72 = arith.truncf %71 : vector<8x8xf32> to vector<8x8xbf16>
    %73 = vector.extract_strided_slice %14 {offsets = [0, 24], sizes = [8, 8], strides = [1, 1]} : vector<8x32xbf16> to vector<8x8xbf16>
    %c0_28 = arith.constant 0 : index
    %c24 = arith.constant 24 : index
    %74 = vector.load %arg13[%c0_28, %c24] : memref<8x64xbf16, #tpu.memory_space<vmem>>, vector<8x8xbf16>
    %c0_29 = arith.constant 0 : index
    %c56 = arith.constant 56 : index
    %75 = vector.load %arg13[%c0_29, %c56] : memref<8x64xbf16, #tpu.memory_space<vmem>>, vector<8x8xbf16>
    %cst_30 = arith.constant dense<0.000000e+00> : vector<8x8xf32>
    %76 = tpu.matmul %73, %74, %cst_30 {dimension_numbers = #tpu.dot_dimension_numbers<[1], [1], [0], [0], [0, 0, 1, 0], [], []>} : vector<8x8xbf16>, vector<8x8xbf16>, vector<8x8xf32> -> vector<8x8xf32>
    %77 = arith.addf %76, %18 : vector<8x8xf32>
    %cst_31 = arith.constant dense<0xFF800000> : vector<8xf32>
    %78 = vector.multi_reduction <maximumf>, %77, %cst_31 [1] : vector<8x8xf32> to vector<8xf32>
    %79 = vector.shape_cast %78 : vector<8xf32> to vector<8x1xf32>
    %80 = vector.broadcast %79 : vector<8x1xf32> to vector<8x8xf32>
    %81 = arith.subf %77, %80 : vector<8x8xf32>
    %82 = math.exp %81 : vector<8x8xf32>
    %cst_32 = arith.constant dense<0.000000e+00> : vector<8xf32>
    %83 = vector.multi_reduction <add>, %82, %cst_32 [1] : vector<8x8xf32> to vector<8xf32>
    %84 = vector.shape_cast %83 : vector<8xf32> to vector<8x1xf32>
    %85 = tpu.reciprocal %84 {approx = true} : vector<8x1xf32> -> vector<8x1xf32>
    %86 = vector.broadcast %85 : vector<8x1xf32> to vector<8x8xf32>
    %87 = arith.mulf %82, %86 : vector<8x8xf32>
    %88 = arith.truncf %87 : vector<8x8xf32> to vector<8x8xbf16>
    %cst_33 = arith.constant dense<0.000000e+00> : vector<8x8xf32>
    %89 = tpu.matmul %88, %75, %cst_33 {dimension_numbers = #tpu.dot_dimension_numbers<[1], [0], [0], [1], [0, 0, 1, 1], [], []>} : vector<8x8xbf16>, vector<8x8xbf16>, vector<8x8xf32> -> vector<8x8xf32>
    %90 = arith.truncf %89 : vector<8x8xf32> to vector<8x8xbf16>
    %91 = tpu.concatenate %36, %54, %72, %90 in 1 : vector<8x8xbf16>, vector<8x8xbf16>, vector<8x8xbf16>, vector<8x8xbf16> -> vector<8x32xbf16>
    %c0_34 = arith.constant 0 : index
    %c0_35 = arith.constant 0 : index
    %92 = vector.load %arg14[%c0_34, %c0_35] : memref<8x32xbf16, #tpu.memory_space<vmem>>, vector<8x32xbf16>
    tpu.vector_store %arg14[%c0_34, %c0_35], %91 {strides = array<i32>} : memref<8x32xbf16, #tpu.memory_space<vmem>>, vector<8x32xbf16>,
    %c0_36 = arith.constant 0 : index
    %c0_37 = arith.constant 0 : index
    %93 = vector.load %arg14[%c0_36, %c0_37] : memref<8x32xbf16, #tpu.memory_space<vmem>>, vector<8x32xbf16>
    %c0_38 = arith.constant 0 : index
    %c0_39 = arith.constant 0 : index
    %94 = vector.load %arg8[%c0_38, %c0_39] : memref<32x32xbf16, #tpu.memory_space<vmem>>, vector<32x32xbf16>
    %cst_40 = arith.constant dense<0.000000e+00> : vector<8x32xf32>
    %95 = tpu.matmul %93, %94, %cst_40 {dimension_numbers = #tpu.dot_dimension_numbers<[1], [0], [0], [1], [0, 0, 1, 1], [], []>} : vector<8x32xbf16>, vector<32x32xbf16>, vector<8x32xf32> -> vector<8x32xf32>
    %c0_41 = arith.constant 0 : index
    %c0_42 = arith.constant 0 : index
    %96 = vector.load %arg9[%c0_41, %c0_42] : memref<1x32xf32, #tpu.memory_space<vmem>>, vector<1x32xf32>
    %97 = vector.broadcast %96 : vector<1x32xf32> to vector<8x32xf32>
    %98 = arith.addf %95, %97 : vector<8x32xf32>
    %99 = arith.addf %7, %98 : vector<8x32xf32>
    %cst_43 = arith.constant dense<0.000000e+00> : vector<8xf32>
    %100 = vector.multi_reduction <add>, %99, %cst_43 [1] : vector<8x32xf32> to vector<8xf32>
    %101 = vector.shape_cast %100 : vector<8xf32> to vector<8x1xf32>
    %cst_44 = arith.constant 3.200000e+01 : f32
    %102 = vector.broadcast %cst_44 : f32 to vector<8x1xf32>
    %103 = arith.divf %101, %102 : vector<8x1xf32>
    %104 = vector.broadcast %103 : vector<8x1xf32> to vector<8x32xf32>
    %105 = arith.subf %99, %104 : vector<8x32xf32>
    %106 = arith.mulf %105, %105 : vector<8x32xf32>
    %cst_45 = arith.constant dense<0.000000e+00> : vector<8xf32>
    %107 = vector.multi_reduction <add>, %106, %cst_45 [1] : vector<8x32xf32> to vector<8xf32>
    %108 = vector.shape_cast %107 : vector<8xf32> to vector<8x1xf32>
    %cst_46 = arith.constant 3.200000e+01 : f32
    %109 = vector.broadcast %cst_46 : f32 to vector<8x1xf32>
    %110 = arith.divf %108, %109 : vector<8x1xf32>
    %111 = vector.broadcast %103 : vector<8x1xf32> to vector<8x32xf32>
    %112 = arith.subf %99, %111 : vector<8x32xf32>
    %cst_47 = arith.constant 9.99999996E-13 : f32
    %113 = vector.broadcast %cst_47 : f32 to vector<8x1xf32>
    %114 = arith.addf %110, %113 : vector<8x1xf32>
    %115 = math.rsqrt %114 : vector<8x1xf32>
    %116 = vector.broadcast %115 : vector<8x1xf32> to vector<8x32xf32>
    %117 = arith.mulf %112, %116 : vector<8x32xf32>
    %c0_48 = arith.constant 0 : index
    %c0_49 = arith.constant 0 : index
    %118 = vector.load %arg10[%c0_48, %c0_49] : memref<1x32xf32, #tpu.memory_space<vmem>>, vector<1x32xf32>
    %119 = vector.broadcast %118 : vector<1x32xf32> to vector<8x32xf32>
    %120 = arith.mulf %117, %119 : vector<8x32xf32>
    %c0_50 = arith.constant 0 : index
    %c0_51 = arith.constant 0 : index
    %121 = vector.load %arg11[%c0_50, %c0_51] : memref<1x32xf32, #tpu.memory_space<vmem>>, vector<1x32xf32>
    %122 = vector.broadcast %121 : vector<1x32xf32> to vector<8x32xf32>
    %123 = arith.addf %120, %122 : vector<8x32xf32>
    %c0_52 = arith.constant 0 : index
    %c0_53 = arith.constant 0 : index
    %c0_54 = arith.constant 0 : index
    %124 = vector.load %arg12[%c0_52, %c0_53, %c0_54] : memref<1x8x32xf32, #tpu.memory_space<vmem>>, vector<1x8x32xf32>
    %125 = vector.shape_cast %124 : vector<1x8x32xf32> to vector<8x32xf32>
    %126 = vector.shape_cast %123 : vector<8x32xf32> to vector<1x8x32xf32>
    tpu.vector_store %arg12[%c0_52, %c0_53, %c0_54], %126 {strides = array<i32>} : memref<1x8x32xf32, #tpu.memory_space<vmem>>, vector<1x8x32xf32>,
    return
  }
  func.func @transform_0(%arg0: i32, %arg1: i32) -> (i32, i32, i32) {
    %c0_i32 = arith.constant 0 : i32
    %c0_i32_0 = arith.constant 0 : i32
    %c0_i32_1 = arith.constant 0 : i32
    return %arg0, %c0_i32, %c0_i32_0 : i32, i32, i32
  }
  func.func @transform_1(%arg0: i32, %arg1: i32) -> (i32, i32, i32) {
    %c0_i32 = arith.constant 0 : i32
    %c0_i32_0 = arith.constant 0 : i32
    %c0_i32_1 = arith.constant 0 : i32
    return %arg0, %c0_i32, %c0_i32_0 : i32, i32, i32
  }
  func.func @transform_2(%arg0: i32, %arg1: i32) -> (i32, i32) {
    %c0_i32 = arith.constant 0 : i32
    %c0_i32_0 = arith.constant 0 : i32
    %c0_i32_1 = arith.constant 0 : i32
    return %c0_i32, %c0_i32_0 : i32, i32
  }
  func.func @transform_3(%arg0: i32, %arg1: i32) -> (i32, i32) {
    %c0_i32 = arith.constant 0 : i32
    %c0_i32_0 = arith.constant 0 : i32
    %c0_i32_1 = arith.constant 0 : i32
    return %c0_i32, %c0_i32_0 : i32, i32
  }
  func.func @transform_4(%arg0: i32, %arg1: i32) -> (i32, i32) {
    %c0_i32 = arith.constant 0 : i32
    %c0_i32_0 = arith.constant 0 : i32
    %c0_i32_1 = arith.constant 0 : i32
    return %c0_i32, %c0_i32_0 : i32, i32
  }
  func.func @transform_5(%arg0: i32, %arg1: i32) -> (i32, i32) {
    %c0_i32 = arith.constant 0 : i32
    %c0_i32_0 = arith.constant 0 : i32
    %c0_i32_1 = arith.constant 0 : i32
    return %c0_i32, %c0_i32_0 : i32, i32
  }
  func.func @transform_6(%arg0: i32, %arg1: i32) -> (i32, i32) {
    %c0_i32 = arith.constant 0 : i32
    %c0_i32_0 = arith.constant 0 : i32
    %c0_i32_1 = arith.constant 0 : i32
    return %c0_i32, %c0_i32_0 : i32, i32
  }
  func.func @transform_7(%arg0: i32, %arg1: i32) -> (i32, i32) {
    %c0_i32 = arith.constant 0 : i32
    %c0_i32_0 = arith.constant 0 : i32
    %c0_i32_1 = arith.constant 0 : i32
    return %c0_i32, %c0_i32_0 : i32, i32
  }
  func.func @transform_8(%arg0: i32, %arg1: i32) -> (i32, i32) {
    %c0_i32 = arith.constant 0 : i32
    %c0_i32_0 = arith.constant 0 : i32
    %c0_i32_1 = arith.constant 0 : i32
    return %c0_i32, %c0_i32_0 : i32, i32
  }
  func.func @transform_9(%arg0: i32, %arg1: i32) -> (i32, i32) {
    %c0_i32 = arith.constant 0 : i32
    %c0_i32_0 = arith.constant 0 : i32
    %c0_i32_1 = arith.constant 0 : i32
    return %c0_i32, %c0_i32_0 : i32, i32
  }
  func.func @transform_10(%arg0: i32, %arg1: i32) -> (i32, i32, i32) {
    %c0_i32 = arith.constant 0 : i32
    %c0_i32_0 = arith.constant 0 : i32
    return %arg0, %arg1, %c0_i32 : i32, i32, i32
  }
}

module attributes {stable_mosaic.version = 11 : i64} {
  func.func @_mhsa_kernel(%arg0: i32, %arg1: i32, %arg2: memref<1x8x32xf32, #tpu.memory_space<vmem>>, %arg3: memref<1x1x8xf32, #tpu.memory_space<vmem>>, %arg4: memref<32x32xbf16, #tpu.memory_space<vmem>>, %arg5: memref<1x32xf32, #tpu.memory_space<vmem>>, %arg6: memref<32x64xbf16, #tpu.memory_space<vmem>>, %arg7: memref<1x64xf32, #tpu.memory_space<vmem>>, %arg8: memref<32x32xbf16, #tpu.memory_space<vmem>>, %arg9: memref<1x32xf32, #tpu.memory_space<vmem>>, %arg10: memref<1x32xf32, #tpu.memory_space<vmem>>, %arg11: memref<1x32xf32, #tpu.memory_space<vmem>>, %arg12: memref<1x8x32xf32, #tpu.memory_space<vmem>>, %arg13: memref<8x64xbf16, #tpu.memory_space<vmem>>, %arg14: memref<8x32xbf16, #tpu.memory_space<vmem>>) attributes {dimension_semantics = [#tpu.dimension_semantics<parallel>, #tpu.dimension_semantics<arbitrary>], iteration_bounds = array<i64: 2, 1>, scalar_prefetch = 0 : i64, scratch_operands = 2 : i64, tpu.core_type = #tpu.core_type<tc>, window_params = [{transform_indices = @transform_0, window_bounds = array<i64: 1, 8, 32>}, {transform_indices = @transform_1, window_bounds = array<i64: 1, 1, 8>}, {pipeline_mode = #tpu.pipeline_mode<synchronous>, transform_indices = @transform_2, window_bounds = array<i64: 32, 32>}, {pipeline_mode = #tpu.pipeline_mode<synchronous>, transform_indices = @transform_3, window_bounds = array<i64: 1, 32>}, {pipeline_mode = #tpu.pipeline_mode<synchronous>, transform_indices = @transform_4, window_bounds = array<i64: 32, 64>}, {pipeline_mode = #tpu.pipeline_mode<synchronous>, transform_indices = @transform_5, window_bounds = array<i64: 1, 64>}, {pipeline_mode = #tpu.pipeline_mode<synchronous>, transform_indices = @transform_6, window_bounds = array<i64: 32, 32>}, {pipeline_mode = #tpu.pipeline_mode<synchronous>, transform_indices = @transform_7, window_bounds = array<i64: 1, 32>}, {pipeline_mode = #tpu.pipeline_mode<synchronous>, transform_indices = @transform_8, window_bounds = array<i64: 1, 32>}, {pipeline_mode = #tpu.pipeline_mode<synchronous>, transform_indices = @transform_9, window_bounds = array<i64: 1, 32>}, {transform_indices = @transform_10, window_bounds = array<i64: 1, 8, 32>}]} {
    %c0_i32 = arith.constant 0 : i32
    %0 = arith.cmpi eq, %arg1, %c0_i32 : i32
    %1 = arith.extui %0 : i1 to i32
    %c0_i32_0 = arith.constant 0 : i32
    %2 = arith.cmpi ne, %1, %c0_i32_0 : i32
    scf.if %2 {
      %c0_55 = arith.constant 0 : index
      %c0_56 = arith.constant 0 : index
      %c0_57 = arith.constant 0 : index
      %127 = vector.load %arg2[%c0_55, %c0_56, %c0_57] : memref<1x8x32xf32, #tpu.memory_space<vmem>>, vector<1x8x32xf32>
      %128 = vector.shape_cast %127 : vector<1x8x32xf32> to vector<8x32xf32>
      %129 = arith.truncf %128 : vector<8x32xf32> to vector<8x32xbf16>
      %c0_58 = arith.constant 0 : index
      %c0_59 = arith.constant 0 : index
      %130 = vector.load %arg6[%c0_58, %c0_59] : memref<32x64xbf16, #tpu.memory_space<vmem>>, vector<32x64xbf16>
      %cst_60 = arith.constant dense<0.000000e+00> : vector<8x64xf32>
      %131 = tpu.matmul %129, %130, %cst_60 {dimension_numbers = #tpu.dot_dimension_numbers<[1], [0], [0], [1], [0, 0, 1, 1], [], []>} : vector<8x32xbf16>, vector<32x64xbf16>, vector<8x64xf32> -> vector<8x64xf32>
      %c0_61 = arith.constant 0 : index
      %c0_62 = arith.constant 0 : index
      %132 = vector.load %arg7[%c0_61, %c0_62] : memref<1x64xf32, #tpu.memory_space<vmem>>, vector<1x64xf32>
      %133 = vector.broadcast %132 : vector<1x64xf32> to vector<8x64xf32>
      %134 = arith.addf %131, %133 : vector<8x64xf32>
      %135 = arith.truncf %134 : vector<8x64xf32> to vector<8x64xbf16>
      %c0_63 = arith.constant 0 : index
      %c0_64 = arith.constant 0 : index
      %136 = vector.load %arg13[%c0_63, %c0_64] : memref<8x64xbf16, #tpu.memory_space<vmem>>, vector<8x64xbf16>
      tpu.vector_store %arg13[%c0_63, %c0_64], %135 {strides = array<i32>} : memref<8x64xbf16, #tpu.memory_space<vmem>>, vector<8x64xbf16>,
    } else {
    }
    %c8_i32 = arith.constant 8 : i32
    %3 = arith.muli %arg1, %c8_i32 : i32
    %4 = tpu.assume_multiple %3, 8 : i32
    %c0 = arith.constant 0 : index
    %5 = arith.index_cast %4 : i32 to index
    %c0_1 = arith.constant 0 : index
    %6 = vector.load %arg2[%c0, %5, %c0_1] : memref<1x8x32xf32, #tpu.memory_space<vmem>>, vector<1x8x32xf32>
    %7 = vector.shape_cast %6 : vector<1x8x32xf32> to vector<8x32xf32>
    %8 = arith.truncf %7 : vector<8x32xf32> to vector<8x32xbf16>
    %c0_2 = arith.constant 0 : index
    %c0_3 = arith.constant 0 : index
    %9 = vector.load %arg4[%c0_2, %c0_3] : memref<32x32xbf16, #tpu.memory_space<vmem>>, vector<32x32xbf16>
    %cst = arith.constant dense<0.000000e+00> : vector<8x32xf32>
    %10 = tpu.matmul %8, %9, %cst {dimension_numbers = #tpu.dot_dimension_numbers<[1], [0], [0], [1], [0, 0, 1, 1], [], []>} : vector<8x32xbf16>, vector<32x32xbf16>, vector<8x32xf32> -> vector<8x32xf32>
    %c0_4 = arith.constant 0 : index
    %c0_5 = arith.constant 0 : index
    %11 = vector.load %arg5[%c0_4, %c0_5] : memref<1x32xf32, #tpu.memory_space<vmem>>, vector<1x32xf32>
    %12 = vector.broadcast %11 : vector<1x32xf32> to vector<8x32xf32>
    %13 = arith.addf %10, %12 : vector<8x32xf32>
    %14 = arith.truncf %13 : vector<8x32xf32> to vector<8x32xbf16>
    %c0_6 = arith.constant 0 : index
    %c0_7 = arith.constant 0 : index
    %c0_8 = arith.constant 0 : index
    %15 = vector.load %arg3[%c0_6, %c0_7, %c0_8] : memref<1x1x8xf32, #tpu.memory_space<vmem>>, vector<1x1x8xf32>
    %16 = vector.shape_cast %15 : vector<1x1x8xf32> to vector<1x8xf32>
    %17 = vector.shape_cast %16 : vector<1x8xf32> to vector<1x8xf32>
    %18 = vector.broadcast %17 : vector<1x8xf32> to vector<8x8xf32>
    %19 = vector.extract_strided_slice %14 {offsets = [0, 0], sizes = [8, 8], strides = [1, 1]} : vector<8x32xbf16> to vector<8x8xbf16>
    %c0_9 = arith.constant 0 : index
    %c0_10 = arith.constant 0 : index
    %20 = vector.load %arg13[%c0_9, %c0_10] : memref<8x64xbf16, #tpu.memory_space<vmem>>, vector<8x8xbf16>
    %c0_11 = arith.constant 0 : index
    %c32 = arith.constant 32 : index
    %21 = vector.load %arg13[%c0_11, %c32] : memref<8x64xbf16, #tpu.memory_space<vmem>>, vector<8x8xbf16>
    %cst_12 = arith.constant dense<0.000000e+00> : vector<8x8xf32>
    %22 = tpu.matmul %19, %20, %cst_12 {dimension_numbers = #tpu.dot_dimension_numbers<[1], [1], [0], [0], [0, 0, 1, 0], [], []>} : vector<8x8xbf16>, vector<8x8xbf16>, vector<8x8xf32> -> vector<8x8xf32>
    %23 = arith.addf %22, %18 : vector<8x8xf32>
    %cst_13 = arith.constant dense<0xFF800000> : vector<8xf32>
    %24 = vector.multi_reduction <maximumf>, %23, %cst_13 [1] : vector<8x8xf32> to vector<8xf32>
    %25 = vector.shape_cast %24 : vector<8xf32> to vector<8x1xf32>
    %26 = vector.broadcast %25 : vector<8x1xf32> to vector<8x8xf32>
    %27 = arith.subf %23, %26 : vector<8x8xf32>
    %28 = math.exp %27 : vector<8x8xf32>
    %cst_14 = arith.constant dense<0.000000e+00> : vector<8xf32>
    %29 = vector.multi_reduction <add>, %28, %cst_14 [1] : vector<8x8xf32> to vector<8xf32>
    %30 = vector.shape_cast %29 : vector<8xf32> to vector<8x1xf32>
    %31 = tpu.reciprocal %30 {approx = true} : vector<8x1xf32> -> vector<8x1xf32>
    %32 = vector.broadcast %31 : vector<8x1xf32> to vector<8x8xf32>
    %33 = arith.mulf %28, %32 : vector<8x8xf32>
    %34 = arith.truncf %33 : vector<8x8xf32> to vector<8x8xbf16>
    %cst_15 = arith.constant dense<0.000000e+00> : vector<8x8xf32>
    %35 = tpu.matmul %34, %21, %cst_15 {dimension_numbers = #tpu.dot_dimension_numbers<[1], [0], [0], [1], [0, 0, 1, 1], [], []>} : vector<8x8xbf16>, vector<8x8xbf16>, vector<8x8xf32> -> vector<8x8xf32>
    %36 = arith.truncf %35 : vector<8x8xf32> to vector<8x8xbf16>
    %37 = vector.extract_strided_slice %14 {offsets = [0, 8], sizes = [8, 8], strides = [1, 1]} : vector<8x32xbf16> to vector<8x8xbf16>
    %c0_16 = arith.constant 0 : index
    %c8 = arith.constant 8 : index
    %38 = vector.load %arg13[%c0_16, %c8] : memref<8x64xbf16, #tpu.memory_space<vmem>>, vector<8x8xbf16>
    %c0_17 = arith.constant 0 : index
    %c40 = arith.constant 40 : index
    %39 = vector.load %arg13[%c0_17, %c40] : memref<8x64xbf16, #tpu.memory_space<vmem>>, vector<8x8xbf16>
    %cst_18 = arith.constant dense<0.000000e+00> : vector<8x8xf32>
    %40 = tpu.matmul %37, %38, %cst_18 {dimension_numbers = #tpu.dot_dimension_numbers<[1], [1], [0], [0], [0, 0, 1, 0], [], []>} : vector<8x8xbf16>, vector<8x8xbf16>, vector<8x8xf32> -> vector<8x8xf32>
    %41 = arith.addf %40, %18 : vector<8x8xf32>
    %cst_19 = arith.constant dense<0xFF800000> : vector<8xf32>
    %42 = vector.multi_reduction <maximumf>, %41, %cst_19 [1] : vector<8x8xf32> to vector<8xf32>
    %43 = vector.shape_cast %42 : vector<8xf32> to vector<8x1xf32>
    %44 = vector.broadcast %43 : vector<8x1xf32> to vector<8x8xf32>
    %45 = arith.subf %41, %44 : vector<8x8xf32>
    %46 = math.exp %45 : vector<8x8xf32>
    %cst_20 = arith.constant dense<0.000000e+00> : vector<8xf32>
    %47 = vector.multi_reduction <add>, %46, %cst_20 [1] : vector<8x8xf32> to vector<8xf32>
    %48 = vector.shape_cast %47 : vector<8xf32> to vector<8x1xf32>
    %49 = tpu.reciprocal %48 {approx = true} : vector<8x1xf32> -> vector<8x1xf32>
    %50 = vector.broadcast %49 : vector<8x1xf32> to vector<8x8xf32>
    %51 = arith.mulf %46, %50 : vector<8x8xf32>
    %52 = arith.truncf %51 : vector<8x8xf32> to vector<8x8xbf16>
    %cst_21 = arith.constant dense<0.000000e+00> : vector<8x8xf32>
    %53 = tpu.matmul %52, %39, %cst_21 {dimension_numbers = #tpu.dot_dimension_numbers<[1], [0], [0], [1], [0, 0, 1, 1], [], []>} : vector<8x8xbf16>, vector<8x8xbf16>, vector<8x8xf32> -> vector<8x8xf32>
    %54 = arith.truncf %53 : vector<8x8xf32> to vector<8x8xbf16>
    %55 = vector.extract_strided_slice %14 {offsets = [0, 16], sizes = [8, 8], strides = [1, 1]} : vector<8x32xbf16> to vector<8x8xbf16>
    %c0_22 = arith.constant 0 : index
    %c16 = arith.constant 16 : index
    %56 = vector.load %arg13[%c0_22, %c16] : memref<8x64xbf16, #tpu.memory_space<vmem>>, vector<8x8xbf16>
    %c0_23 = arith.constant 0 : index
    %c48 = arith.constant 48 : index
    %57 = vector.load %arg13[%c0_23, %c48] : memref<8x64xbf16, #tpu.memory_space<vmem>>, vector<8x8xbf16>
    %cst_24 = arith.constant dense<0.000000e+00> : vector<8x8xf32>
    %58 = tpu.matmul %55, %56, %cst_24 {dimension_numbers = #tpu.dot_dimension_numbers<[1], [1], [0], [0], [0, 0, 1, 0], [], []>} : vector<8x8xbf16>, vector<8x8xbf16>, vector<8x8xf32> -> vector<8x8xf32>
    %59 = arith.addf %58, %18 : vector<8x8xf32>
    %cst_25 = arith.constant dense<0xFF800000> : vector<8xf32>
    %60 = vector.multi_reduction <maximumf>, %59, %cst_25 [1] : vector<8x8xf32> to vector<8xf32>
    %61 = vector.shape_cast %60 : vector<8xf32> to vector<8x1xf32>
    %62 = vector.broadcast %61 : vector<8x1xf32> to vector<8x8xf32>
    %63 = arith.subf %59, %62 : vector<8x8xf32>
    %64 = math.exp %63 : vector<8x8xf32>
    %cst_26 = arith.constant dense<0.000000e+00> : vector<8xf32>
    %65 = vector.multi_reduction <add>, %64, %cst_26 [1] : vector<8x8xf32> to vector<8xf32>
    %66 = vector.shape_cast %65 : vector<8xf32> to vector<8x1xf32>
    %67 = tpu.reciprocal %66 {approx = true} : vector<8x1xf32> -> vector<8x1xf32>
    %68 = vector.broadcast %67 : vector<8x1xf32> to vector<8x8xf32>
    %69 = arith.mulf %64, %68 : vector<8x8xf32>
    %70 = arith.truncf %69 : vector<8x8xf32> to vector<8x8xbf16>
    %cst_27 = arith.constant dense<0.000000e+00> : vector<8x8xf32>
    %71 = tpu.matmul %70, %57, %cst_27 {dimension_numbers = #tpu.dot_dimension_numbers<[1], [0], [0], [1], [0, 0, 1, 1], [], []>} : vector<8x8xbf16>, vector<8x8xbf16>, vector<8x8xf32> -> vector<8x8xf32>
    %72 = arith.truncf %71 : vector<8x8xf32> to vector<8x8xbf16>
    %73 = vector.extract_strided_slice %14 {offsets = [0, 24], sizes = [8, 8], strides = [1, 1]} : vector<8x32xbf16> to vector<8x8xbf16>
    %c0_28 = arith.constant 0 : index
    %c24 = arith.constant 24 : index
    %74 = vector.load %arg13[%c0_28, %c24] : memref<8x64xbf16, #tpu.memory_space<vmem>>, vector<8x8xbf16>
    %c0_29 = arith.constant 0 : index
    %c56 = arith.constant 56 : index
    %75 = vector.load %arg13[%c0_29, %c56] : memref<8x64xbf16, #tpu.memory_space<vmem>>, vector<8x8xbf16>
    %cst_30 = arith.constant dense<0.000000e+00> : vector<8x8xf32>
    %76 = tpu.matmul %73, %74, %cst_30 {dimension_numbers = #tpu.dot_dimension_numbers<[1], [1], [0], [0], [0, 0, 1, 0], [], []>} : vector<8x8xbf16>, vector<8x8xbf16>, vector<8x8xf32> -> vector<8x8xf32>
    %77 = arith.addf %76, %18 : vector<8x8xf32>
    %cst_31 = arith.constant dense<0xFF800000> : vector<8xf32>
    %78 = vector.multi_reduction <maximumf>, %77, %cst_31 [1] : vector<8x8xf32> to vector<8xf32>
    %79 = vector.shape_cast %78 : vector<8xf32> to vector<8x1xf32>
    %80 = vector.broadcast %79 : vector<8x1xf32> to vector<8x8xf32>
    %81 = arith.subf %77, %80 : vector<8x8xf32>
    %82 = math.exp %81 : vector<8x8xf32>
    %cst_32 = arith.constant dense<0.000000e+00> : vector<8xf32>
    %83 = vector.multi_reduction <add>, %82, %cst_32 [1] : vector<8x8xf32> to vector<8xf32>
    %84 = vector.shape_cast %83 : vector<8xf32> to vector<8x1xf32>
    %85 = tpu.reciprocal %84 {approx = true} : vector<8x1xf32> -> vector<8x1xf32>
    %86 = vector.broadcast %85 : vector<8x1xf32> to vector<8x8xf32>
    %87 = arith.mulf %82, %86 : vector<8x8xf32>
    %88 = arith.truncf %87 : vector<8x8xf32> to vector<8x8xbf16>
    %cst_33 = arith.constant dense<0.000000e+00> : vector<8x8xf32>
    %89 = tpu.matmul %88, %75, %cst_33 {dimension_numbers = #tpu.dot_dimension_numbers<[1], [0], [0], [1], [0, 0, 1, 1], [], []>} : vector<8x8xbf16>, vector<8x8xbf16>, vector<8x8xf32> -> vector<8x8xf32>
    %90 = arith.truncf %89 : vector<8x8xf32> to vector<8x8xbf16>
    %91 = tpu.concatenate %36, %54, %72, %90 in 1 : vector<8x8xbf16>, vector<8x8xbf16>, vector<8x8xbf16>, vector<8x8xbf16> -> vector<8x32xbf16>
    %c0_34 = arith.constant 0 : index
    %c0_35 = arith.constant 0 : index
    %92 = vector.load %arg14[%c0_34, %c0_35] : memref<8x32xbf16, #tpu.memory_space<vmem>>, vector<8x32xbf16>
    tpu.vector_store %arg14[%c0_34, %c0_35], %91 {strides = array<i32>} : memref<8x32xbf16, #tpu.memory_space<vmem>>, vector<8x32xbf16>,
    %c0_36 = arith.constant 0 : index
    %c0_37 = arith.constant 0 : index
    %93 = vector.load %arg14[%c0_36, %c0_37] : memref<8x32xbf16, #tpu.memory_space<vmem>>, vector<8x32xbf16>
    %c0_38 = arith.constant 0 : index
    %c0_39 = arith.constant 0 : index
    %94 = vector.load %arg8[%c0_38, %c0_39] : memref<32x32xbf16, #tpu.memory_space<vmem>>, vector<32x32xbf16>
    %cst_40 = arith.constant dense<0.000000e+00> : vector<8x32xf32>
    %95 = tpu.matmul %93, %94, %cst_40 {dimension_numbers = #tpu.dot_dimension_numbers<[1], [0], [0], [1], [0, 0, 1, 1], [], []>} : vector<8x32xbf16>, vector<32x32xbf16>, vector<8x32xf32> -> vector<8x32xf32>
    %c0_41 = arith.constant 0 : index
    %c0_42 = arith.constant 0 : index
    %96 = vector.load %arg9[%c0_41, %c0_42] : memref<1x32xf32, #tpu.memory_space<vmem>>, vector<1x32xf32>
    %97 = vector.broadcast %96 : vector<1x32xf32> to vector<8x32xf32>
    %98 = arith.addf %95, %97 : vector<8x32xf32>
    %99 = arith.addf %7, %98 : vector<8x32xf32>
    %cst_43 = arith.constant dense<0.000000e+00> : vector<8xf32>
    %100 = vector.multi_reduction <add>, %99, %cst_43 [1] : vector<8x32xf32> to vector<8xf32>
    %101 = vector.shape_cast %100 : vector<8xf32> to vector<8x1xf32>
    %cst_44 = arith.constant 3.200000e+01 : f32
    %102 = vector.broadcast %cst_44 : f32 to vector<8x1xf32>
    %103 = arith.divf %101, %102 : vector<8x1xf32>
    %104 = vector.broadcast %103 : vector<8x1xf32> to vector<8x32xf32>
    %105 = arith.subf %99, %104 : vector<8x32xf32>
    %106 = arith.mulf %105, %105 : vector<8x32xf32>
    %cst_45 = arith.constant dense<0.000000e+00> : vector<8xf32>
    %107 = vector.multi_reduction <add>, %106, %cst_45 [1] : vector<8x32xf32> to vector<8xf32>
    %108 = vector.shape_cast %107 : vector<8xf32> to vector<8x1xf32>
    %cst_46 = arith.constant 3.200000e+01 : f32
    %109 = vector.broadcast %cst_46 : f32 to vector<8x1xf32>
    %110 = arith.divf %108, %109 : vector<8x1xf32>
    %111 = vector.broadcast %103 : vector<8x1xf32> to vector<8x32xf32>
    %112 = arith.subf %99, %111 : vector<8x32xf32>
    %cst_47 = arith.constant 9.99999996E-13 : f32
    %113 = vector.broadcast %cst_47 : f32 to vector<8x1xf32>
    %114 = arith.addf %110, %113 : vector<8x1xf32>
    %115 = math.rsqrt %114 : vector<8x1xf32>
    %116 = vector.broadcast %115 : vector<8x1xf32> to vector<8x32xf32>
    %117 = arith.mulf %112, %116 : vector<8x32xf32>
    %c0_48 = arith.constant 0 : index
    %c0_49 = arith.constant 0 : index
    %118 = vector.load %arg10[%c0_48, %c0_49] : memref<1x32xf32, #tpu.memory_space<vmem>>, vector<1x32xf32>
    %119 = vector.broadcast %118 : vector<1x32xf32> to vector<8x32xf32>
    %120 = arith.mulf %117, %119 : vector<8x32xf32>
    %c0_50 = arith.constant 0 : index
    %c0_51 = arith.constant 0 : index
    %121 = vector.load %arg11[%c0_50, %c0_51] : memref<1x32xf32, #tpu.memory_space<vmem>>, vector<1x32xf32>
    %122 = vector.broadcast %121 : vector<1x32xf32> to vector<8x32xf32>
    %123 = arith.addf %120, %122 : vector<8x32xf32>
    %c0_52 = arith.constant 0 : index
    %c0_53 = arith.constant 0 : index
    %c0_54 = arith.constant 0 : index
    %124 = vector.load %arg12[%c0_52, %c0_53, %c0_54] : memref<1x8x32xf32, #tpu.memory_space<vmem>>, vector<1x8x32xf32>
    %125 = vector.shape_cast %124 : vector<1x8x32xf32> to vector<8x32xf32>
    %126 = vector.shape_cast %123 : vector<8x32xf32> to vector<1x8x32xf32>
    tpu.vector_store %arg12[%c0_52, %c0_53, %c0_54], %126 {strides = array<i32>} : memref<1x8x32xf32, #tpu.memory_space<vmem>>, vector<1x8x32xf32>,
    return
  }
  func.func @transform_0(%arg0: i32, %arg1: i32) -> (i32, i32, i32) {
    %c0_i32 = arith.constant 0 : i32
    %c0_i32_0 = arith.constant 0 : i32
    %c0_i32_1 = arith.constant 0 : i32
    return %arg0, %c0_i32, %c0_i32_0 : i32, i32, i32
  }
  func.func @transform_1(%arg0: i32, %arg1: i32) -> (i32, i32, i32) {
    %c0_i32 = arith.constant 0 : i32
    %c0_i32_0 = arith.constant 0 : i32
    %c0_i32_1 = arith.constant 0 : i32
    return %arg0, %c0_i32, %c0_i32_0 : i32, i32, i32
  }
  func.func @transform_2(%arg0: i32, %arg1: i32) -> (i32, i32) {
    %c0_i32 = arith.constant 0 : i32
    %c0_i32_0 = arith.constant 0 : i32
    %c0_i32_1 = arith.constant 0 : i32
    return %c0_i32, %c0_i32_0 : i32, i32
  }
  func.func @transform_3(%arg0: i32, %arg1: i32) -> (i32, i32) {
    %c0_i32 = arith.constant 0 : i32
    %c0_i32_0 = arith.constant 0 : i32
    %c0_i32_1 = arith.constant 0 : i32
    return %c0_i32, %c0_i32_0 : i32, i32
  }
  func.func @transform_4(%arg0: i32, %arg1: i32) -> (i32, i32) {
    %c0_i32 = arith.constant 0 : i32
    %c0_i32_0 = arith.constant 0 : i32
    %c0_i32_1 = arith.constant 0 : i32
    return %c0_i32, %c0_i32_0 : i32, i32
  }
  func.func @transform_5(%arg0: i32, %arg1: i32) -> (i32, i32) {
    %c0_i32 = arith.constant 0 : i32
    %c0_i32_0 = arith.constant 0 : i32
    %c0_i32_1 = arith.constant 0 : i32
    return %c0_i32, %c0_i32_0 : i32, i32
  }
  func.func @transform_6(%arg0: i32, %arg1: i32) -> (i32, i32) {
    %c0_i32 = arith.constant 0 : i32
    %c0_i32_0 = arith.constant 0 : i32
    %c0_i32_1 = arith.constant 0 : i32
    return %c0_i32, %c0_i32_0 : i32, i32
  }
  func.func @transform_7(%arg0: i32, %arg1: i32) -> (i32, i32) {
    %c0_i32 = arith.constant 0 : i32
    %c0_i32_0 = arith.constant 0 : i32
    %c0_i32_1 = arith.constant 0 : i32
    return %c0_i32, %c0_i32_0 : i32, i32
  }
  func.func @transform_8(%arg0: i32, %arg1: i32) -> (i32, i32) {
    %c0_i32 = arith.constant 0 : i32
    %c0_i32_0 = arith.constant 0 : i32
    %c0_i32_1 = arith.constant 0 : i32
    return %c0_i32, %c0_i32_0 : i32, i32
  }
  func.func @transform_9(%arg0: i32, %arg1: i32) -> (i32, i32) {
    %c0_i32 = arith.constant 0 : i32
    %c0_i32_0 = arith.constant 0 : i32
    %c0_i32_1 = arith.constant 0 : i32
    return %c0_i32, %c0_i32_0 : i32, i32
  }
  func.func @transform_10(%arg0: i32, %arg1: i32) -> (i32, i32, i32) {
    %c0_i32 = arith.constant 0 : i32
    %c0_i32_0 = arith.constant 0 : i32
    return %arg0, %arg1, %c0_i32 : i32, i32, i32
  }
}

</mosaic_0001>

<bundles_post_ra>
// kernel: tpu_custom_call.1
= control target key start
LH: loop header
LB: loop body
LE: loop exit
PB: predicated region body
PF: predicated region fallthrough
CT: control target
= control target key end

     0   :  { %s1811_s0 = inlined_call_operand.hbm [shape: f32[2,8,32], index: 0, kind: input, shape index: {}]   ;;  %s1812_s1 = inlined_call_operand.hbm [shape: f32[2,1,8], index: 1, kind: input, shape index: {}]   ;;  %s1813_s2 = inlined_call_operand.hbm [shape: bf16[32,32], index: 2, kind: input, shape index: {}]   ;;  %s1814_s3 = inlined_call_operand.vmem [shape: f32[1,32], index: 3, kind: input, shape index: {}]   ;;  %s1815_s4 = inlined_call_operand.hbm [shape: bf16[32,64], index: 4, kind: input, shape index: {}]   ;;  %s1816_s5 = inlined_call_operand.vmem [shape: f32[1,64], index: 5, kind: input, shape index: {}]   ;;  %s1817_s6 = inlined_call_operand.hbm [shape: bf16[32,32], index: 6, kind: input, shape index: {}]   ;;  %s1818_s7 = inlined_call_operand.vmem [shape: f32[1,32], index: 7, kind: input, shape index: {}]   ;;  %s1819_s8 = inlined_call_operand.vmem [shape: f32[1,32], index: 8, kind: input, shape index: {}]   ;;  %s1820_s9 = inlined_call_operand.vmem [shape: f32[1,32], index: 9, kind: input, shape index: {}]   ;;  %s1821_s10 = inlined_call_operand.hbm [shape: f32[2,8,32], index: 10, kind: output, shape index: {}]  }
   0x1   :  { %1829 = sst [smem:[#allocation25_spill]] %s1813_s2 }
   0x2   :  { %1830 = sst [smem:[#allocation26_spill]] %s1815_s4 }
   0x3   :  { %1831 = sst [smem:[#allocation27_spill]] %s1817_s6 }
   0x4   :  { %1832 = sst [smem:[#allocation28_spill]] %s1820_s9 }
   0x5   :  { %1833 = sst [smem:[#allocation29_spill]] %s1821_s10 }
   0x6   :  { %15 = vsyncpa [#allocation5], 0 }
   0x7   :  { %17 = vsyncpa [#allocation5 + $0x1], 0 }
   0x8   :  { %18 = vsyncpa [#allocation8], 0 }
   0x9   :  { %20 = vsyncpa [#allocation8 + $0x1], 0 }
   0xa   :  { %21 = vsyncpa [#allocation11], 0 }
   0xb   :  { %22 = vsyncpa [#allocation6], 0 }
   0xc   :  { %24 = vsyncpa [#allocation6 + $0x1], 0  ;;  %s1565_s13 = smov 0   ;;  %s1567_s14 = smov 0  }
   0xd   :  { %s1569_s15 = smov 0   ;;  %s1571_s16 = smov 0  }
   0xe   :  { %s1573_s17 = smov 0   ;;  %s1575_s18 = smov 0  }
   0xf LB: > { %1834 = sst [smem:[#allocation19_spill]] %s1472_s13  ;;  %s1596_s19 = sadd.s32 4294967295, %s1492_s18   ;;  %s1492_s18 = sphi %s1575_s18, %s30_s18   ;;  %s1488_s17 = sphi %s1573_s17, %s1860_s17   ;;  %s1484_s16 = sphi %s1571_s16, %s1859_s16   ;;  %s1480_s15 = sphi %s1569_s15, %s1855_s15   ;;  %s1476_s14 = sphi %s1567_s14, %s1858_s14   ;;  %s1472_s13 = sphi %s1565_s13, %s1857_s13  }
  0x10   : > { %1835 = sst [smem:[#allocation20_spill]] %s1480_s15  ;;  %p1053_p0 = scmp.ge.s32.totalorder %s1492_s18, 1 }
  0x11   : > { %p63_p1 = scmp.eq.s32.totalorder %s1596_s19, 0  ;;  %p295_p2 = scmp.lt.s32.totalorder %s1492_s18, 3 }
  0x12   : > { %s1836_s2 = sld [smem:[#allocation25_spill]]  ;;  %s1494_s24 = smov [#allocation9]  }
  0x13   : > { %p1604_p3 = pnand %p1053_p0, %p295_p2  ;;  %s308_s25 = sshll.u32 %s1494_s24, 4  ;;  %s309_s25 = int_to_ptr.vmem [resolvable:$true] %s308_s25 }
  0x14   : > { %p1057_p6 = scmp.ge.s32.totalorder %s1492_s18, 2  ;;  %s1839_s4 = sld [smem:[#allocation26_spill]] }
  0x15   : > { %p1129_p4 = pneg %p1604_p3  ;;  %s1495_s30 = smov 64  }
  0x16   : > { %s1496_s11 = smov 4   ;;  %s1497_s12 = smov [#allocation10]  }
  0x17   : > { %p1612_p5 = pnand %p1129_p4, %p63_p1  ;;  %s325_s20 = sshll.u32 %s1497_s12, 4  ;;  %s326_s20 = int_to_ptr.vmem [resolvable:$true] %s325_s20 }
  0x18   : > { %s306_s22 = sshll.u32 %s1836_s2, 4  ;;  %s1840_s6 = sld [smem:[#allocation27_spill]]  ;;  %s307_s22 = int_to_ptr.hbm [resolvable:$true] %s306_s22 }
  0x19   : > { %1132 = dma.hbm_to_vmem [thread:$0]  (!%p1612_p5), %s307_s22, 256, %s309_s25, [#allocation8], %s1495_s30, %s1495_s30, %s1496_s11  }
  0x1a   : > { %s323_s29 = sshll.u32 %s1839_s4, 4  ;;  %s1498_s28 = smov [#allocation12]   ;;  %s324_s29 = int_to_ptr.hbm [resolvable:$true] %s323_s29 }
  0x1b   : > { %1135 = dma.hbm_to_vmem [thread:$0]  (!%p1612_p5), %s324_s29, 256, %s326_s20, [#allocation11], %s1495_s30, %s1495_s30, %s1496_s11  }
  0x1c   : > { %s342_s2 = sshll.u32 %s1498_s28, 4  ;;  %s1052_s22 = sadd.s32 4294967294, %s1492_s18   ;;  %s343_s2 = int_to_ptr.vmem [resolvable:$true] %s342_s2 }
  0x1d   : > { %s42_s25 = sadd.s32 1, %s1488_s17  ;;  %s49_s12 = sadd.s32 1, %s1480_s15 }
  0x1e   : > { %s340_s27 = sshll.u32 %s1840_s6, 4  ;;  %p44_p7 = scmp.ge.s32.totalorder %s42_s25, 2  ;;  %s341_s27 = int_to_ptr.hbm [resolvable:$true] %s340_s27 }
  0x1f   : > { %1138 = dma.hbm_to_vmem [thread:$0]  (!%p1612_p5), %s341_s27, 256, %s343_s2, [#allocation11], %s1495_s30, %s1495_s30, %s1496_s11  }
  0x20   : > { %p56_p8 = scmp.ne.s32.totalorder %s1480_s15, %s1476_s14  ;;  %p57_p9 = scmp.eq.s32.totalorder %s1492_s18, 0 }
  0x21   : > { %p62_p10 = scmp.ne.s32.totalorder %s1476_s14, %s1472_s13  ;;  %s1862_s25 = smov (%p44_p7, %s42_s25), 0 }
  0x22   : > { %1841 = sst [smem:[#allocation21_spill]] %s1862_s25  ;;  %p1639_p11 = por %p57_p9, %p56_p8 }
  0x23   : > { %p1645_p12 = por %p63_p1, %p62_p10  ;;  %s46_s26 = ssub.s32 %s1488_s17, %s1862_s25 }
  0x24   : > { %p282_p13 = scmp.eq.s32.totalorder %s1596_s19, 1  ;;  %p47_p0 = scmp.eq.s32.totalorder %s46_s26, 0 }
  0x25   : > { %p288_p2 = scmp.eq.s32.totalorder %s1052_s22, 1  ;;  %p1153_p5 = scmp.lt.s32.totalorder %s1492_s18, 2 }
  0x26   : > { %p1652_p4 = por %p282_p13, %p56_p8  ;;  %s365_s21 = sand.u32 1, %s1480_s15  }
  0x27   : > { %s1658_s11 = scalar_select %p47_p0, %s1480_s15, %s49_s12  }
  0x28   : > { %s1844_s30 = scalar_select %p1652_p4, 1, 0 }
  0x29   : > { %1846 = sst [smem:[#allocation23_spill]] %s1658_s11  ;;  %p1660_p7 = por %p288_p2, %p62_p10 }
  0x2a   : > { %1845 = sst [smem:[#allocation22_spill]] %s1844_s30  ;;  %s1058_s24 = sshll.u32 %s365_s21, 3 }
  0x2b   : > { %s1847_s20 = scalar_select %p1660_p7, 1, 0 }
  0x2c   : > { %s1059_s27 = sshll.u32 %s1488_s17, 3  ;;  %s369_s22 = scalar_lea.vmem [#allocation4], %s1058_s24 }
  0x2d   : > { %1848 = sst [smem:[#allocation24_spill]] %s1847_s20  ;;  %s373_s26 = scalar_lea.hbm %s1811_s0, %s1059_s27 }
  0x2e   : > { %s377_s6 = sshll.u32 %s369_s22, 4  ;;  %s375_s25 = sshll.u32 %s373_s26, 4  ;;  %s378_s6 = int_to_ptr.vmem [resolvable:$true] %s377_s6  ;;  %s376_s25 = int_to_ptr.hbm [resolvable:$true] %s375_s25 }
  0x2f   : > { %p1140_p8 = pnand %p1153_p5, %p1639_p11  ;;  %s384_s12 = sand.u32 1, %s1492_s18  }
  0x30   : > { %s366_s11 = scalar_lea.sflag [#allocation5], %s365_s21  ;;  %s390_s15 = scalar_lea.hbm %s1812_s1, %s1488_s17 }
  0x31   : > { %1142 = dma.hbm_to_vmem [thread:$0]  (!%p1140_p8), %s376_s25, 128, %s378_s6, %s366_s11  }
  0x32   : > { %s387_s20 = scalar_lea.vmem [#allocation7], %s365_s21  ;;  %s392_s10 = sshll.u32 %s390_s15, 4  ;;  %s393_s10 = int_to_ptr.hbm [resolvable:$true] %s392_s10 }
  0x33   : > { %s394_s30 = sshll.u32 %s387_s20, 4  ;;  %s385_s4 = scalar_lea.sflag [#allocation8], %s384_s12  ;;  %s395_s30 = int_to_ptr.vmem [resolvable:$true] %s394_s30 }
  0x34   : > { %1145 = dma.hbm_to_vmem [thread:$0]  (!%p1140_p8), %s393_s10, 16, %s395_s30, %s385_s4  }
  0x35   : > { %403 = sbr.rel (%p1604_p3) target bundleno = 1682 (0x692), region = 60  ;;  %s1679_s29 = sand.u32 (!%p1604_p3), 1, %s1476_s14  }
  0x36   : > { %s1061_s6 = sshll.u32 (!%p1604_p3), %s1679_s29, 3  ;;  %s406_s9 = scalar_lea.sflag (!%p1604_p3), [#allocation5], %s1679_s29 }
  0x37   : > { %s409_s13 = scalar_lea.vmem (!%p1604_p3), [#allocation4], %s1061_s6 }
  0x3a   : > { %1451 = dma.done.wait (%p1645_p12), %s406_s9, 128  }
  0x3b   : > { %1453 = vsyncadd (%p1645_p12), %s406_s9, 4294967168  ;;  %s415_s10 = sand.u32 1, %s1596_s19   ;;  %s418_s23 = scalar_lea.vmem [#allocation7], %s1679_s29 }
  0x3c   : > { %s416_s15 = scalar_lea.sflag [#allocation8], %s415_s10 }
  0x3d   : > { %1455 = dma.done.wait (%p1645_p12), %s416_s15, 16  }
  0x3e   : > { %1457 = vsyncadd (%p1645_p12), %s416_s15, 4294967280 }
  0x3f   : > { %1459 = dma.done.wait (%p63_p1), [#allocation8], 256  }
  0x40   : > { %1461 = vsyncadd (%p63_p1), [#allocation8], 4294967040 }
  0x41   : > { %1463 = dma.done.wait (%p63_p1), [#allocation11], 512  }
  0x42   : > { %1465 = vsyncadd (%p63_p1), [#allocation11], 4294966784  ;;  %v1106_v0 = vld [vmem:[#allocation10 + $0x8] sm:$0xff]  ;;  %v1108_v1 = vld [vmem:[#allocation9 + $0x8] sm:$0xff]  ;;  %vm502_vm0 = vcmask 261120   ;;  %vm520_vm1 = vcmask 519168  }
  0x43   : > { %v1105_v2 = vld [vmem:[#allocation10] sm:$0xff]  ;;  %v1107_v3 = vld [vmem:[#allocation9] sm:$0xff]  ;;  %512 = vmatpush.bf16.msra.mxu0 %v1106_v0  ;;  %556 = vmatpush.bf16.msra.mxu1 %v1108_v1  ;;  %s1499_s11 = smov 120   ;;  %vm569_vm2 = vcmask 64512   ;;  %s1500_s20 = smov 112   ;;  %vm609_vm3 = vcmask 1043456  }
  0x44   : > { %v1703_v4 = vld [vmem:[%s409_s13] sm:$0xff]  ;;  %v1222_v6 = vld [vmem:[%s1816_s5] ss:$0 sm:$0xff]  ;;  %s1501_s21 = smov 96   ;;  %s1502_s24 = smov 104   ;;  %vm819_vm4 = vcmask 130048  }
  0x45   : > { %v481_v5 = vpack.c.bf16 %v1703_v4, %v1703_v4  ;;  %v1223_v7 = vld [vmem:[%s1814_s3] ss:$0 sm:$0xff]  ;;  %s1503_s27 = smov 88   ;;  %s1504_s28 = smov 80   ;;  %vm822_vm5 = vcmask 195584   ;;  %vm826_vm6 = vcmask 257024  }
  0x46   : > { %v1224_v30 = vld [vmem:[%s418_s23] ss:$0 sm:$0xff]  ;;  %s1505_s26 = smov 72   ;;  %s1506_s22 = smov 8  }
  0x47   : > { %513 = vmatpush.bf16.msra.mxu0 %v1105_v2  ;;  %557 = vmatpush.bf16.msra.mxu1 %v1107_v3  ;;  %s1507_s12 = smov 16   ;;  %s1508_s4 = smov 24  }
  0x48   : > { %s1102_s10 = sshll.u32 %s1484_s16, 3  ;;  %s1849_s2 = sld [smem:[#allocation29_spill]] }
  0x49   : > { %s474_s16 = scalar_lea.vmem [#allocation13], %s1061_s6 }
  0x4a   : > { %1074 = vmatmul.msk.bf16.vlgmr.msra.gmra.mxu0 %vm502_vm0, %v481_v5  ;;  %1083 = vmatmul.msk.bf16.vlgmr.msra.gmra.mxu1 %vm502_vm0, %v481_v5 }
  0x4e   : > { %s918_s30 = scalar_lea.hbm %s1849_s2, %s1102_s10  ;;  %s1418_s6 = scalar_lea.hbm %s1849_s2, 16 }
  0xc7   : > { %v515_v8 = vpop.f32.mrf.mxu0  ;;  %v559_v9 = vpop.f32.mrf.mxu1 }
  0xc8   : > { %v516_v10 = vadd.f32 %v1222_v6, %v515_v8  ;;  %v560_v11 = vadd.f32 %v1223_v7, %v559_v9 }
  0xca   : > { %v519_v12 = vpack.c.bf16 %v516_v10, %v516_v10  ;;  %v563_v13 = vpack.c.bf16 %v560_v11, %v560_v11 }
  0xcc   : > { %521 = vst.msk [vmem:[#allocation2] sm:$0xf] %vm520_vm1, %v519_v12  ;;  %v628_v14 = vunpack.c.l.b16 %v563_v13 }
  0xce   : > { %v629_v15 = vpack.c.b16 %v628_v14, %v628_v14 }
  0xcf   : > { %v517_v16 = vpop.f32.mrf.mxu0  ;;  %v561_v17 = vpop.f32.mrf.mxu1 }
  0xd0   : > { %630 = vrot.lane.b32.xlu2 %v629_v15, %s1499_s11 }
  0xd3   : > { %v568_v18 = vld [vmem:[#allocation2] sm:$0xf] }
  0xd4   : > { %v574_v19 = vsel %vm569_vm2, %v568_v18, 0  ;;  %v602_v20 = vunpack.c.l.b16 %v568_v18 }
  0xd5   : > { %583 = vmatpush.bf16.xpose.msra.mxu2 %v574_v19 }
  0xd6   : > { %v1716_v21 = vpack.c.b16 %v602_v20, %v602_v20 }
  0xd8   : > { %689 = vrot.lane.b32.xlu2 %v1716_v21, %s1500_s20  ;;  %604 = vrot.lane.b32.xlu1 %v1716_v21, %s1501_s21 }
  0xdc   : > { %1084 = vmatmul.msk.bf16.vlgmr.msra.gmra.mxu2 %vm569_vm2, %v563_v13 }
  0xe0   : > { %744 = vrot.lane.b32.xlu2 %v629_v15, %s1502_s24  ;;  %632 = vrot.lane.b32.xlu1 %v1716_v21, %s1499_s11 }
  0xe8   : > { %687 = vrot.lane.b32.xlu1 %v629_v15, %s1500_s20 }
 0x12a   : > { %v631_v22 = vpop.permute.xlu2 %630 }
 0x132   : > { %v690_v23 = vpop.permute.xlu2 %689 }
 0x133   : > { %v695_v24 = vsel %vm569_vm2, %v690_v23, 0 }
 0x134   : > { %704 = vmatpush.bf16.xpose.msrb.mxu1 %v695_v24 }
 0x13a   : > { %v745_v44 = vpop.permute.xlu2 %744 }
 0x14a   : > { %v605_v25 = vpop.permute.xlu1 %604 }
 0x14b   : > { %v611_v26 = vsel %vm609_vm3, %v605_v25, 0 }
 0x14c   : > { %620 = vmatpush.bf16.msra.mxu3 %v611_v26 }
 0x152   : > { %v633_v27 = vpop.permute.xlu1 %632 }
 0x153   : > { %v638_v28 = vsel %vm569_vm2, %v633_v27, 0 }
 0x154   : > { %647 = vmatpush.bf16.xpose.msrb.mxu3 %v638_v28 }
 0x15a   : > { %v688_v29 = vpop.permute.xlu1 %687 }
 0x15b   : > { %1088 = vmatmul.msk.bf16.vlgmr.msrb.gmra.mxu1 %vm569_vm2, %v688_v29 }
 0x15f   : > { %v585_v31 = vpop.f32.mrf.mxu2 }
 0x160   : > { %v586_v32 = vadd.f32 %v1224_v30, %v585_v31 }
 0x162   : > { %v589_v33 = vsel %vm569_vm2, %v586_v32, -inf }
 0x163   : > { %590 = vmax.xlane.f32.xlu0 %v589_v33 }
 0x167   : > { %v587_v34 = vpop.f32.mrf.mxu2 }
 0x1d6   : > { %v591_v35 = vpop.xlane.xlu0 %590 }
 0x1d7   : > { %v592_v36 = vsub.f32 %v586_v32, %v591_v35 }
 0x1d8   : > { %v706_v37 = vpop.f32.mrf.mxu1 }
 0x1d9   : > { %v593_v38 = vmul.f32 1.442695, %v592_v36  ;;  %v707_v39 = vadd.f32 %v1224_v30, %v706_v37 }
 0x1db   : > { %1228 = vpow2.f32 %v593_v38  ;;  %v710_v40 = vsel %vm569_vm2, %v707_v39, -inf }
 0x1dc   : > { %711 = vmax.xlane.f32.xlu2 %v710_v40 }
 0x1e0   : > { %v708_v41 = vpop.f32.mrf.mxu1 }
 0x1e1   : > { %v1229_v42 = vpop.eup %1228 }
 0x1e2   : > { %v595_v43 = vsel %vm569_vm2, %v1229_v42, 0.0 }
 0x1e3   : > { %596 = vadd.xlane.f32.xlu0 %v595_v43 }
 0x1f7   : > { %746 = vrot.lane.b32.xlu0 %v1716_v21, %s1502_s24  ;;  %s1851_s24 = sld [smem:[#allocation28_spill]] }
 0x24f   : > { %v712_v45 = vpop.xlane.xlu2 %711 }
 0x250   : > { %v713_v46 = vsub.f32 %v707_v39, %v712_v45 }
 0x252   : > { %v714_v47 = vmul.f32 1.442695, %v713_v46  ;;  %v1110_v46 = vld [vmem:[#allocation12 + $0x8] sm:$0xff] }
 0x253   : > { %858 = vmatpush.bf16.msra.mxu1 %v1110_v46 }
 0x254   : > { %1230 = vpow2.f32 %v714_v47  ;;  %v1109_v47 = vld [vmem:[#allocation12] sm:$0xff] }
 0x256   : > { %v597_v48 = vpop.xlane.xlu0 %596 }
 0x257   : > { %1232 = vrcp.f32 %v597_v48  ;;  %859 = vmatpush.bf16.msra.mxu1 %v1109_v47 }
 0x25a   : > { %v1231_v49 = vpop.eup %1230 }
 0x25b   : > { %v716_v50 = vsel %vm569_vm2, %v1231_v49, 0.0 }
 0x25c   : > { %717 = vadd.xlane.f32.xlu2 %v716_v50 }
 0x25d   : > { %v1233_v51 = vpop.eup %1232 }
 0x25e   : > { %v599_v52 = vmul.f32 %v1233_v51, %v1229_v42 }
 0x260   : > { %v600_v53 = vpack.c.bf16 %v599_v52, %v599_v52 }
 0x262   : > { %1085 = vmatmul.msk.bf16.vlgmr.msra.gmra.mxu3 %vm569_vm2, %v600_v53 }
 0x269   : > { %v747_v54 = vpop.permute.xlu0 %746 }
 0x26a   : > { %v752_v55 = vsel %vm569_vm2, %v747_v54, 0 }
 0x26b   : > { %761 = vmatpush.bf16.xpose.msra.mxu3 %v752_v55 }
 0x272   : > { %1086 = vmatmul.msk.bf16.vlgmr.msrb.gmra.mxu3 %vm569_vm2, %v631_v22 }
 0x282   : > { %1090 = vmatmul.msk.bf16.vlgmr.msra.gmra.mxu3 %vm569_vm2, %v745_v44 }
 0x2cf   : > { %v718_v15 = vpop.xlane.xlu2 %717 }
 0x2e5   : > { %v1739_v56 = vpop.f32.mrf.mxu3 }
 0x2ed   : > { %v624_v57 = vpop.f32.mrf.mxu3 }
 0x2ee   : > { %v1225_v57 = vld [vmem:[%s1818_s7] ss:$0 sm:$0xff] }
 0x2f5   : > { %v649_v58 = vpop.f32.mrf.mxu3 }
 0x2f6   : > { %v650_v59 = vadd.f32 %v1224_v30, %v649_v58 }
 0x2f8   : > { %v653_v60 = vsel %vm569_vm2, %v650_v59, -inf }
 0x2f9   : > { %654 = vmax.xlane.f32.xlu1 %v653_v60 }
 0x2fd   : > { %v651_v61 = vpop.f32.mrf.mxu3 }
 0x305   : > { %v763_v62 = vpop.f32.mrf.mxu3 }
 0x306   : > { %v764_v63 = vadd.f32 %v1224_v30, %v763_v62  ;;  %v1509_v62 = vmov 32.0  }
 0x308   : > { %v767_v0 = vsel %vm569_vm2, %v764_v63, -inf }
 0x309   : > { %768 = vmax.xlane.f32.xlu0 %v767_v0 }
 0x30d   : > { %v765_v1 = vpop.f32.mrf.mxu3 }
 0x312   : > { %665 = vrot.lane.b32.xlu1 %v1716_v21, %s1503_s27  ;;  %s920_s27 = sshll.u32 %s474_s16, 4  ;;  %s921_s27 = int_to_ptr.vmem [resolvable:$true] %s920_s27 }
 0x36c   : > { %v655_v2 = vpop.xlane.xlu1 %654 }
 0x36d   : > { %v656_v3 = vsub.f32 %v650_v59, %v655_v2 }
 0x36f   : > { %v657_v5 = vmul.f32 1.442695, %v656_v3 }
 0x371   : > { %1234 = vpow2.f32 %v657_v5 }
 0x377   : > { %v1235_v6 = vpop.eup %1234 }
 0x378   : > { %v659_v7 = vsel %vm569_vm2, %v1235_v6, 0.0 }
 0x379   : > { %660 = vadd.xlane.f32.xlu2 %v659_v7 }
 0x37c   : > { %v769_v8 = vpop.xlane.xlu0 %768 }
 0x37d   : > { %v770_v9 = vsub.f32 %v764_v63, %v769_v8 }
 0x37f   : > { %v771_v10 = vmul.f32 1.442695, %v770_v9 }
 0x381   : > { %1236 = vpow2.f32 %v771_v10 }
 0x382   : > { %1238 = vrcp.f32 %v718_v15 }
 0x384   : > { %v666_v11 = vpop.permute.xlu1 %665 }
 0x385   : > { %v671_v12 = vsel %vm609_vm3, %v666_v11, 0 }
 0x386   : > { %680 = vmatpush.bf16.msrb.mxu0 %v671_v12 }
 0x387   : > { %v1237_v13 = vpop.eup %1236 }
 0x388   : > { %v773_v14 = vsel %vm569_vm2, %v1237_v13, 0.0  ;;  %v1239_v17 = vpop.eup %1238 }
 0x389   : > { %774 = vadd.xlane.f32.xlu0 %v773_v14  ;;  %v720_v19 = vmul.f32 %v1239_v17, %v1231_v49  ;;  %v626_v49 = vpack.c.bf16 %v1739_v56, %v1739_v56 }
 0x38b   : > { %v721_v25 = vpack.c.bf16 %v720_v19, %v720_v19  ;;  %v1226_v19 = vld [vmem:[%s1819_s8] ss:$0 sm:$0xff] }
 0x391   : > { %722 = vrot.lane.b32.xlu2 %v1716_v21, %s1504_s28  ;;  %s922_s28 = sshll.u32 %s918_s30, 4  ;;  %s923_s28 = int_to_ptr.hbm [resolvable:$true] %s922_s28 }
 0x39d   : > { %779 = vrot.lane.b32.xlu0 %v1716_v21, %s1505_s26  ;;  %s907_s26 = scalar_lea.sflag [#allocation6], %s1679_s29 }
 0x3ec   : > { %v661_v16 = vpop.xlane.xlu2 %660 }
 0x3ed   : > { %1240 = vrcp.f32 %v661_v16 }
 0x3f3   : > { %v1241_v18 = vpop.eup %1240 }
 0x3f4   : > { %v663_v20 = vmul.f32 %v1241_v18, %v1235_v6  ;;  %v723_v22 = vpop.permute.xlu2 %722 }
 0x3f5   : > { %v728_v23 = vsel %vm609_vm3, %v723_v22, 0 }
 0x3f6   : > { %737 = vmatpush.bf16.msrb.mxu2 %v728_v23  ;;  %v664_v24 = vpack.c.bf16 %v663_v20, %v663_v20  ;;  %v1227_v23 = vld [vmem:[%s1851_s24] ss:$0 sm:$0xff] }
 0x3f8   : > { %1087 = vmatmul.msk.bf16.vlgmr.msrb.gmra.mxu0 %vm569_vm2, %v664_v24 }
 0x3f9   : > { %1089 = vmatmul.msk.bf16.vlgmr.msrb.gmra.mxu2 %vm569_vm2, %v721_v25 }
 0x3fc   : > { %v775_v26 = vpop.xlane.xlu0 %774 }
 0x3fd   : > { %1242 = vrcp.f32 %v775_v26 }
 0x3fe   : > { %1244 = vrcp.f32 %v1509_v62 }
 0x403   : > { %v1243_v21 = vpop.eup %1242 }
 0x404   : > { %v777_v27 = vmul.f32 %v1243_v21, %v1237_v13  ;;  %v1245_v63 = vpop.eup %1244 }
 0x405   : > { %v870_v0 = vmul.f32 32.0, %v1245_v63  ;;  %vm874_vm7 = vweird.f32 %v1245_v63 }
 0x406   : > { %v778_v30 = vpack.c.bf16 %v777_v27, %v777_v27 }
 0x407   : > { %v871_v1 = vsub.f32 1.0, %v870_v0 }
 0x409   : > { %v872_v2 = vmul.f32 %v1245_v63, %v871_v1 }
 0x40b   : > { %v873_v3 = vadd.f32 %v1245_v63, %v872_v2 }
 0x40d   : > { %v875_v5 = vsel %vm874_vm7, %v1245_v63, %v873_v3 }
 0x40f   : > { %v780_v28 = vpop.permute.xlu0 %779 }
 0x410   : > { %v785_v29 = vsel %vm609_vm3, %v780_v28, 0 }
 0x411   : > { %794 = vmatpush.bf16.msra.mxu0 %v785_v29 }
 0x414   : > { %1091 = vmatmul.msk.bf16.vlgmr.msra.gmra.mxu0 %vm569_vm2, %v778_v30 }
 0x475   : > { %v682_v31 = vpop.f32.mrf.mxu0 }
 0x476   : > { %v686_v32 = vpack.c.bf16 %v682_v31, %v682_v31 }
 0x478   : > { %v802_v33 = vunpack.c.l.b16 %v686_v32 }
 0x47a   : > { %v803_v34 = vpack.c.b16 %v802_v33, %v802_v33 }
 0x47c   : > { %v739_v35 = vpop.f32.mrf.mxu2  ;;  %804 = vrot.lane.b32.xlu1 %v803_v34, %s1506_s22  ;;  %s1412_s22 = sshra.s32 %s923_s28, 4  ;;  %s1413_s22 = int_to_ptr.hbm [resolvable:$true] %s1412_s22 }
 0x47d   : > { %v743_v36 = vpack.c.bf16 %v739_v35, %v739_v35  ;;  %v684_v37 = vpop.f32.mrf.mxu0  ;;  %p1419_p10 = scmp.lt.s32.totalorder %s1413_s22, %s1849_s2 }
 0x47f   : > { %v807_v38 = vunpack.c.l.b16 %v743_v36 }
 0x481   : > { %v808_v39 = vpack.c.b16 %v807_v38, %v807_v38 }
 0x484   : > { %v741_v40 = vpop.f32.mrf.mxu2  ;;  %809 = vrot.lane.b32.xlu1 %v808_v39, %s1507_s12  ;;  %s1414_s12 = scalar_lea.hbm %s1413_s22, 8 }
 0x485   : > { %p1415_p1 = scmp.ne.s32.totalorder %s1413_s22, %s1414_s12  ;;  %p1420_p11 = scmp.lt.s32.totalorder %s1418_s6, %s1414_s12 }
 0x487   : > { %p1416_p3 = pnand %p1415_p1, %p1652_p4  ;;  %p1421_p12 = por %p1420_p11, %p1419_p10 }
 0x489   : > { %p1417_p9 = pneg %p1416_p3 }
 0x48b   : > { %p1422_p13 = pnand %p1421_p12, %p1417_p9 }
 0x491   : > { %v796_v41 = vpop.f32.mrf.mxu0 }
 0x492   : > { %v800_v42 = vpack.c.bf16 %v796_v41, %v796_v41 }
 0x494   : > { %v812_v43 = vunpack.c.l.b16 %v800_v42 }
 0x496   : > { %v813_v44 = vpack.c.b16 %v812_v43, %v812_v43 }
 0x498   : > { %814 = vrot.lane.b32.xlu2 %v813_v44, %s1508_s4 }
 0x499   : > { %v798_v45 = vpop.f32.mrf.mxu0 }
 0x4ee   : > { %v805_v48 = vpop.permute.xlu1 %804 }
 0x4ef   : > { %v818_v50 = vsel %vm569_vm2, %v626_v49, %v805_v48 }
 0x4f2   : > { %v815_v52 = vpop.permute.xlu2 %814 }
 0x4f6   : > { %v810_v51 = vpop.permute.xlu1 %809 }
 0x4f7   : > { %v821_v53 = vsel %vm819_vm4, %v818_v50, %v810_v51 }
 0x4f8   : > { %v824_v54 = vsel %vm822_vm5, %v821_v53, %v815_v52 }
 0x4f9   : > { %827 = vst.msk [vmem:[#allocation3] sm:$0xf] %vm826_vm6, %v824_v54 }
 0x500   : > { %v828_v55 = vld [vmem:[#allocation3] sm:$0xf] }
 0x501   : > { %1100 = vmatmul.msk.bf16.vlgmr.msra.gmra.mxu1 %vm502_vm0, %v828_v55 }
 0x57e   : > { %v861_v58 = vpop.f32.mrf.mxu1 }
 0x57f   : > { %v862_v59 = vadd.f32 %v1225_v57, %v861_v58 }
 0x581   : > { %v865_v56 = vadd.f32 %v862_v59, %v1703_v4 }
 0x583   : > { %v866_v60 = vsel %vm502_vm0, %v865_v56, 0.0 }
 0x584   : > { %867 = vadd.xlane.f32.xlu0 %v866_v60 }
 0x586   : > { %v863_v61 = vpop.f32.mrf.mxu1 }
 0x5f7   : > { %v868_v6 = vpop.xlane.xlu0 %867 }
 0x5f8   : > { %v876_v7 = vmul.f32 %v875_v5, %v868_v6 }
 0x5fa   : > { %v877_v8 = vsub.f32 %v865_v56, %v876_v7 }
 0x5fc   : > { %v878_v9 = vmul.f32 %v877_v8, %v877_v8 }
 0x5fe   : > { %v879_v4 = vsel %vm502_vm0, %v878_v9, 0.0 }
 0x5ff   : > { %880 = vadd.xlane.f32.xlu1 %v879_v4 }
 0x672   : > { %v881_v10 = vpop.xlane.xlu1 %880 }
 0x673   : > { %v882_v11 = vmul.f32 %v881_v10, %v875_v5 }
 0x675   : > { %v883_v12 = vadd.f32 1e-12, %v882_v11 }
 0x677   : > { %1246 = vrsqrt.f32 %v883_v12  ;;  %vm890_vm9 = vweird.f32 %v883_v12 }
 0x67d   : > { %v1247_v13 = vpop.eup %1246 }
 0x67e   : > { %v885_v14 = vmul.f32 %v1247_v13, %v883_v12  ;;  %vm891_vm8 = vweird.f32 %v1247_v13 }
 0x67f   : > { %vm892_vm10 = vmor %vm890_vm9, %vm891_vm8 }
 0x680   : > { %v886_v15 = vmul.f32 %v1247_v13, %v885_v14 }
 0x682   : > { %v887_v16 = vmul.f32 0.5, %v886_v15 }
 0x684   : > { %v888_v17 = vsub.f32 1.5, %v887_v16 }
 0x686   : > { %v889_v18 = vmul.f32 %v1247_v13, %v888_v17 }
 0x688   : > { %v893_v20 = vsel %vm892_vm10, %v1247_v13, %v889_v18 }
 0x689   : > { %v894_v22 = vmul.f32 %v893_v20, %v877_v8 }
 0x68b   : > { %v899_v24 = vmul.f32 %v1226_v19, %v894_v22 }
 0x68d   : > { %v904_v25 = vadd.f32 %v1227_v23, %v899_v24 }
 0x68f   : > { %905 = vst.msk [vmem:[%s474_s16] sm:$0xff] %vm502_vm0, %v904_v25 }
 0x690   : > { %1425 = shalt.err (!%p1422_p13)
}
 0x691   : > { %1127 = dma.vmem_to_hbm [thread:$0]  (%p1652_p4), %s921_s27, 128, %s923_s28, %s907_s26  }
 0x692 PF: > { %s1852_s29 = sld [smem:[#allocation19_spill]]  ;;  %p1147_p0 = pnand %p1057_p6, %p1660_p7 }
 0x694   : > { %p1148_p2 = pneg %p1147_p0 }
 0x698   : > { %s934_s23 = sand.u32 1, %s1852_s29  }
 0x699   : > { %s935_s19 = scalar_lea.sflag [#allocation6], %s934_s23 }
 0x69a   : > { %1467 = dma.done.wait (%p1148_p2), %s935_s19, 128  }
 0x69b   : > { %1469 = vsyncadd (%p1148_p2), %s935_s19, 4294967168  ;;  %s30_s18 = sadd.s32 1, %s1492_s18   ;;  %s1854_s25 = sld [smem:[#allocation20_spill]] }
 0x69c   : > { %p27_p5 = scmp.ge.s32.totalorder %s30_s18, 4   ;;  %s1855_s15 = sld [smem:[#allocation23_spill]] }
 0x69d   : > { %s1856_s30 = sld [smem:[#allocation21_spill]]  ;;  %s1857_s13 = smov %s1476_s14 }
 0x69e   : > { %s1859_s16 = smov %s1488_s17 }
 0x69f   :  { %29 = sbr.rel (!%p27_p5) target bundleno = 15 (0xf), region = 135 }
 0x6a1   : > { %s1858_s14 = smov %s1854_s25 }
 0x6a3   : > { %s1860_s17 = smov %s1856_s30 }
 0x6a4   :  { %941 = vsyncpa [#allocation5], 1 }
 0x6a5   :  { %943 = vsyncpa [#allocation5 + $0x1], 1 }
 0x6a6   :  { %944 = vsyncpa [#allocation8], 1 }
 0x6a7   :  { %946 = vsyncpa [#allocation8 + $0x1], 1 }
 0x6a8   :  { %947 = vsyncpa [#allocation11], 1 }
 0x6a9   :  { %948 = vsyncpa [#allocation6], 1 }
 0x6aa   :  { %950 = vsyncpa [#allocation6 + $0x1], 1 }

// kernel: tpu_custom_call.1
= control target key start
LH: loop header
LB: loop body
LE: loop exit
PB: predicated region body
PF: predicated region fallthrough
CT: control target
= control target key end

     0   :  { %s1811_s0 = inlined_call_operand.hbm [shape: f32[2,8,32], index: 0, kind: input, shape index: {}]   ;;  %s1812_s1 = inlined_call_operand.hbm [shape: f32[2,1,8], index: 1, kind: input, shape index: {}]   ;;  %s1813_s2 = inlined_call_operand.hbm [shape: bf16[32,32], index: 2, kind: input, shape index: {}]   ;;  %s1814_s3 = inlined_call_operand.vmem [shape: f32[1,32], index: 3, kind: input, shape index: {}]   ;;  %s1815_s4 = inlined_call_operand.hbm [shape: bf16[32,64], index: 4, kind: input, shape index: {}]   ;;  %s1816_s5 = inlined_call_operand.vmem [shape: f32[1,64], index: 5, kind: input, shape index: {}]   ;;  %s1817_s6 = inlined_call_operand.hbm [shape: bf16[32,32], index: 6, kind: input, shape index: {}]   ;;  %s1818_s7 = inlined_call_operand.vmem [shape: f32[1,32], index: 7, kind: input, shape index: {}]   ;;  %s1819_s8 = inlined_call_operand.vmem [shape: f32[1,32], index: 8, kind: input, shape index: {}]   ;;  %s1820_s9 = inlined_call_operand.vmem [shape: f32[1,32], index: 9, kind: input, shape index: {}]   ;;  %s1821_s10 = inlined_call_operand.hbm [shape: f32[2,8,32], index: 10, kind: output, shape index: {}]  }
   0x1   :  { %1829 = sst [smem:[#allocation25_spill]] %s1813_s2 }
   0x2   :  { %1830 = sst [smem:[#allocation26_spill]] %s1815_s4 }
   0x3   :  { %1831 = sst [smem:[#allocation27_spill]] %s1817_s6 }
   0x4   :  { %1832 = sst [smem:[#allocation28_spill]] %s1820_s9 }
   0x5   :  { %1833 = sst [smem:[#allocation29_spill]] %s1821_s10 }
   0x6   :  { %15 = vsyncpa [#allocation5], 0 }
   0x7   :  { %17 = vsyncpa [#allocation5 + $0x1], 0 }
   0x8   :  { %18 = vsyncpa [#allocation8], 0 }
   0x9   :  { %20 = vsyncpa [#allocation8 + $0x1], 0 }
   0xa   :  { %21 = vsyncpa [#allocation11], 0 }
   0xb   :  { %22 = vsyncpa [#allocation6], 0 }
   0xc   :  { %24 = vsyncpa [#allocation6 + $0x1], 0  ;;  %s1565_s13 = smov 0   ;;  %s1567_s14 = smov 0  }
   0xd   :  { %s1569_s15 = smov 0   ;;  %s1571_s16 = smov 0  }
   0xe   :  { %s1573_s17 = smov 0   ;;  %s1575_s18 = smov 0  }
   0xf LB: > { %1834 = sst [smem:[#allocation19_spill]] %s1472_s13  ;;  %s1596_s19 = sadd.s32 4294967295, %s1492_s18   ;;  %s1492_s18 = sphi %s1575_s18, %s30_s18   ;;  %s1488_s17 = sphi %s1573_s17, %s1860_s17   ;;  %s1484_s16 = sphi %s1571_s16, %s1859_s16   ;;  %s1480_s15 = sphi %s1569_s15, %s1855_s15   ;;  %s1476_s14 = sphi %s1567_s14, %s1858_s14   ;;  %s1472_s13 = sphi %s1565_s13, %s1857_s13  }
  0x10   : > { %1835 = sst [smem:[#allocation20_spill]] %s1480_s15  ;;  %p1053_p0 = scmp.ge.s32.totalorder %s1492_s18, 1 }
  0x11   : > { %p63_p1 = scmp.eq.s32.totalorder %s1596_s19, 0  ;;  %p295_p2 = scmp.lt.s32.totalorder %s1492_s18, 3 }
  0x12   : > { %s1836_s2 = sld [smem:[#allocation25_spill]]  ;;  %s1494_s24 = smov [#allocation9]  }
  0x13   : > { %p1604_p3 = pnand %p1053_p0, %p295_p2  ;;  %s308_s25 = sshll.u32 %s1494_s24, 4  ;;  %s309_s25 = int_to_ptr.vmem [resolvable:$true] %s308_s25 }
  0x14   : > { %p1057_p6 = scmp.ge.s32.totalorder %s1492_s18, 2  ;;  %s1839_s4 = sld [smem:[#allocation26_spill]] }
  0x15   : > { %p1129_p4 = pneg %p1604_p3  ;;  %s1495_s30 = smov 64  }
  0x16   : > { %s1496_s11 = smov 4   ;;  %s1497_s12 = smov [#allocation10]  }
  0x17   : > { %p1612_p5 = pnand %p1129_p4, %p63_p1  ;;  %s325_s20 = sshll.u32 %s1497_s12, 4  ;;  %s326_s20 = int_to_ptr.vmem [resolvable:$true] %s325_s20 }
  0x18   : > { %s306_s22 = sshll.u32 %s1836_s2, 4  ;;  %s1840_s6 = sld [smem:[#allocation27_spill]]  ;;  %s307_s22 = int_to_ptr.hbm [resolvable:$true] %s306_s22 }
  0x19   : > { %1132 = dma.hbm_to_vmem [thread:$0]  (!%p1612_p5), %s307_s22, 256, %s309_s25, [#allocation8], %s1495_s30, %s1495_s30, %s1496_s11  }
  0x1a   : > { %s323_s29 = sshll.u32 %s1839_s4, 4  ;;  %s1498_s28 = smov [#allocation12]   ;;  %s324_s29 = int_to_ptr.hbm [resolvable:$true] %s323_s29 }
  0x1b   : > { %1135 = dma.hbm_to_vmem [thread:$0]  (!%p1612_p5), %s324_s29, 256, %s326_s20, [#allocation11], %s1495_s30, %s1495_s30, %s1496_s11  }
  0x1c   : > { %s342_s2 = sshll.u32 %s1498_s28, 4  ;;  %s1052_s22 = sadd.s32 4294967294, %s1492_s18   ;;  %s343_s2 = int_to_ptr.vmem [resolvable:$true] %s342_s2 }
  0x1d   : > { %s42_s25 = sadd.s32 1, %s1488_s17  ;;  %s49_s12 = sadd.s32 1, %s1480_s15 }
  0x1e   : > { %s340_s27 = sshll.u32 %s1840_s6, 4  ;;  %p44_p7 = scmp.ge.s32.totalorder %s42_s25, 2  ;;  %s341_s27 = int_to_ptr.hbm [resolvable:$true] %s340_s27 }
  0x1f   : > { %1138 = dma.hbm_to_vmem [thread:$0]  (!%p1612_p5), %s341_s27, 256, %s343_s2, [#allocation11], %s1495_s30, %s1495_s30, %s1496_s11  }
  0x20   : > { %p56_p8 = scmp.ne.s32.totalorder %s1480_s15, %s1476_s14  ;;  %p57_p9 = scmp.eq.s32.totalorder %s1492_s18, 0 }
  0x21   : > { %p62_p10 = scmp.ne.s32.totalorder %s1476_s14, %s1472_s13  ;;  %s1862_s25 = smov (%p44_p7, %s42_s25), 0 }
  0x22   : > { %1841 = sst [smem:[#allocation21_spill]] %s1862_s25  ;;  %p1639_p11 = por %p57_p9, %p56_p8 }
  0x23   : > { %p1645_p12 = por %p63_p1, %p62_p10  ;;  %s46_s26 = ssub.s32 %s1488_s17, %s1862_s25 }
  0x24   : > { %p282_p13 = scmp.eq.s32.totalorder %s1596_s19, 1  ;;  %p47_p0 = scmp.eq.s32.totalorder %s46_s26, 0 }
  0x25   : > { %p288_p2 = scmp.eq.s32.totalorder %s1052_s22, 1  ;;  %p1153_p5 = scmp.lt.s32.totalorder %s1492_s18, 2 }
  0x26   : > { %p1652_p4 = por %p282_p13, %p56_p8  ;;  %s365_s21 = sand.u32 1, %s1480_s15  }
  0x27   : > { %s1658_s11 = scalar_select %p47_p0, %s1480_s15, %s49_s12  }
  0x28   : > { %s1844_s30 = scalar_select %p1652_p4, 1, 0 }
  0x29   : > { %1846 = sst [smem:[#allocation23_spill]] %s1658_s11  ;;  %p1660_p7 = por %p288_p2, %p62_p10 }
  0x2a   : > { %1845 = sst [smem:[#allocation22_spill]] %s1844_s30  ;;  %s1058_s24 = sshll.u32 %s365_s21, 3 }
  0x2b   : > { %s1847_s20 = scalar_select %p1660_p7, 1, 0 }
  0x2c   : > { %s1059_s27 = sshll.u32 %s1488_s17, 3  ;;  %s369_s22 = scalar_lea.vmem [#allocation4], %s1058_s24 }
  0x2d   : > { %1848 = sst [smem:[#allocation24_spill]] %s1847_s20  ;;  %s373_s26 = scalar_lea.hbm %s1811_s0, %s1059_s27 }
  0x2e   : > { %s377_s6 = sshll.u32 %s369_s22, 4  ;;  %s375_s25 = sshll.u32 %s373_s26, 4  ;;  %s378_s6 = int_to_ptr.vmem [resolvable:$true] %s377_s6  ;;  %s376_s25 = int_to_ptr.hbm [resolvable:$true] %s375_s25 }
  0x2f   : > { %p1140_p8 = pnand %p1153_p5, %p1639_p11  ;;  %s384_s12 = sand.u32 1, %s1492_s18  }
  0x30   : > { %s366_s11 = scalar_lea.sflag [#allocation5], %s365_s21  ;;  %s390_s15 = scalar_lea.hbm %s1812_s1, %s1488_s17 }
  0x31   : > { %1142 = dma.hbm_to_vmem [thread:$0]  (!%p1140_p8), %s376_s25, 128, %s378_s6, %s366_s11  }
  0x32   : > { %s387_s20 = scalar_lea.vmem [#allocation7], %s365_s21  ;;  %s392_s10 = sshll.u32 %s390_s15, 4  ;;  %s393_s10 = int_to_ptr.hbm [resolvable:$true] %s392_s10 }
  0x33   : > { %s394_s30 = sshll.u32 %s387_s20, 4  ;;  %s385_s4 = scalar_lea.sflag [#allocation8], %s384_s12  ;;  %s395_s30 = int_to_ptr.vmem [resolvable:$true] %s394_s30 }
  0x34   : > { %1145 = dma.hbm_to_vmem [thread:$0]  (!%p1140_p8), %s393_s10, 16, %s395_s30, %s385_s4  }
  0x35   : > { %403 = sbr.rel (%p1604_p3) target bundleno = 1682 (0x692), region = 60  ;;  %s1679_s29 = sand.u32 (!%p1604_p3), 1, %s1476_s14  }
  0x36   : > { %s1061_s6 = sshll.u32 (!%p1604_p3), %s1679_s29, 3  ;;  %s406_s9 = scalar_lea.sflag (!%p1604_p3), [#allocation5], %s1679_s29 }
  0x37   : > { %s409_s13 = scalar_lea.vmem (!%p1604_p3), [#allocation4], %s1061_s6 }
  0x3a   : > { %1451 = dma.done.wait (%p1645_p12), %s406_s9, 128  }
  0x3b   : > { %1453 = vsyncadd (%p1645_p12), %s406_s9, 4294967168  ;;  %s415_s10 = sand.u32 1, %s1596_s19   ;;  %s418_s23 = scalar_lea.vmem [#allocation7], %s1679_s29 }
  0x3c   : > { %s416_s15 = scalar_lea.sflag [#allocation8], %s415_s10 }
  0x3d   : > { %1455 = dma.done.wait (%p1645_p12), %s416_s15, 16  }
  0x3e   : > { %1457 = vsyncadd (%p1645_p12), %s416_s15, 4294967280 }
  0x3f   : > { %1459 = dma.done.wait (%p63_p1), [#allocation8], 256  }
  0x40   : > { %1461 = vsyncadd (%p63_p1), [#allocation8], 4294967040 }
  0x41   : > { %1463 = dma.done.wait (%p63_p1), [#allocation11], 512  }
  0x42   : > { %1465 = vsyncadd (%p63_p1), [#allocation11], 4294966784  ;;  %v1106_v0 = vld [vmem:[#allocation10 + $0x8] sm:$0xff]  ;;  %v1108_v1 = vld [vmem:[#allocation9 + $0x8] sm:$0xff]  ;;  %vm502_vm0 = vcmask 261120   ;;  %vm520_vm1 = vcmask 519168  }
  0x43   : > { %v1105_v2 = vld [vmem:[#allocation10] sm:$0xff]  ;;  %v1107_v3 = vld [vmem:[#allocation9] sm:$0xff]  ;;  %512 = vmatpush.bf16.msra.mxu0 %v1106_v0  ;;  %556 = vmatpush.bf16.msra.mxu1 %v1108_v1  ;;  %s1499_s11 = smov 120   ;;  %vm569_vm2 = vcmask 64512   ;;  %s1500_s20 = smov 112   ;;  %vm609_vm3 = vcmask 1043456  }
  0x44   : > { %v1703_v4 = vld [vmem:[%s409_s13] sm:$0xff]  ;;  %v1222_v6 = vld [vmem:[%s1816_s5] ss:$0 sm:$0xff]  ;;  %s1501_s21 = smov 96   ;;  %s1502_s24 = smov 104   ;;  %vm819_vm4 = vcmask 130048  }
  0x45   : > { %v481_v5 = vpack.c.bf16 %v1703_v4, %v1703_v4  ;;  %v1223_v7 = vld [vmem:[%s1814_s3] ss:$0 sm:$0xff]  ;;  %s1503_s27 = smov 88   ;;  %s1504_s28 = smov 80   ;;  %vm822_vm5 = vcmask 195584   ;;  %vm826_vm6 = vcmask 257024  }
  0x46   : > { %v1224_v30 = vld [vmem:[%s418_s23] ss:$0 sm:$0xff]  ;;  %s1505_s26 = smov 72   ;;  %s1506_s22 = smov 8  }
  0x47   : > { %513 = vmatpush.bf16.msra.mxu0 %v1105_v2  ;;  %557 = vmatpush.bf16.msra.mxu1 %v1107_v3  ;;  %s1507_s12 = smov 16   ;;  %s1508_s4 = smov 24  }
  0x48   : > { %s1102_s10 = sshll.u32 %s1484_s16, 3  ;;  %s1849_s2 = sld [smem:[#allocation29_spill]] }
  0x49   : > { %s474_s16 = scalar_lea.vmem [#allocation13], %s1061_s6 }
  0x4a   : > { %1074 = vmatmul.msk.bf16.vlgmr.msra.gmra.mxu0 %vm502_vm0, %v481_v5  ;;  %1083 = vmatmul.msk.bf16.vlgmr.msra.gmra.mxu1 %vm502_vm0, %v481_v5 }
  0x4e   : > { %s918_s30 = scalar_lea.hbm %s1849_s2, %s1102_s10  ;;  %s1418_s6 = scalar_lea.hbm %s1849_s2, 16 }
  0xc7   : > { %v515_v8 = vpop.f32.mrf.mxu0  ;;  %v559_v9 = vpop.f32.mrf.mxu1 }
  0xc8   : > { %v516_v10 = vadd.f32 %v1222_v6, %v515_v8  ;;  %v560_v11 = vadd.f32 %v1223_v7, %v559_v9 }
  0xca   : > { %v519_v12 = vpack.c.bf16 %v516_v10, %v516_v10  ;;  %v563_v13 = vpack.c.bf16 %v560_v11, %v560_v11 }
  0xcc   : > { %521 = vst.msk [vmem:[#allocation2] sm:$0xf] %vm520_vm1, %v519_v12  ;;  %v628_v14 = vunpack.c.l.b16 %v563_v13 }
  0xce   : > { %v629_v15 = vpack.c.b16 %v628_v14, %v628_v14 }
  0xcf   : > { %v517_v16 = vpop.f32.mrf.mxu0  ;;  %v561_v17 = vpop.f32.mrf.mxu1 }
  0xd0   : > { %630 = vrot.lane.b32.xlu2 %v629_v15, %s1499_s11 }
  0xd3   : > { %v568_v18 = vld [vmem:[#allocation2] sm:$0xf] }
  0xd4   : > { %v574_v19 = vsel %vm569_vm2, %v568_v18, 0  ;;  %v602_v20 = vunpack.c.l.b16 %v568_v18 }
  0xd5   : > { %583 = vmatpush.bf16.xpose.msra.mxu2 %v574_v19 }
  0xd6   : > { %v1716_v21 = vpack.c.b16 %v602_v20, %v602_v20 }
  0xd8   : > { %689 = vrot.lane.b32.xlu2 %v1716_v21, %s1500_s20  ;;  %604 = vrot.lane.b32.xlu1 %v1716_v21, %s1501_s21 }
  0xdc   : > { %1084 = vmatmul.msk.bf16.vlgmr.msra.gmra.mxu2 %vm569_vm2, %v563_v13 }
  0xe0   : > { %744 = vrot.lane.b32.xlu2 %v629_v15, %s1502_s24  ;;  %632 = vrot.lane.b32.xlu1 %v1716_v21, %s1499_s11 }
  0xe8   : > { %687 = vrot.lane.b32.xlu1 %v629_v15, %s1500_s20 }
 0x12a   : > { %v631_v22 = vpop.permute.xlu2 %630 }
 0x132   : > { %v690_v23 = vpop.permute.xlu2 %689 }
 0x133   : > { %v695_v24 = vsel %vm569_vm2, %v690_v23, 0 }
 0x134   : > { %704 = vmatpush.bf16.xpose.msrb.mxu1 %v695_v24 }
 0x13a   : > { %v745_v44 = vpop.permute.xlu2 %744 }
 0x14a   : > { %v605_v25 = vpop.permute.xlu1 %604 }
 0x14b   : > { %v611_v26 = vsel %vm609_vm3, %v605_v25, 0 }
 0x14c   : > { %620 = vmatpush.bf16.msra.mxu3 %v611_v26 }
 0x152   : > { %v633_v27 = vpop.permute.xlu1 %632 }
 0x153   : > { %v638_v28 = vsel %vm569_vm2, %v633_v27, 0 }
 0x154   : > { %647 = vmatpush.bf16.xpose.msrb.mxu3 %v638_v28 }
 0x15a   : > { %v688_v29 = vpop.permute.xlu1 %687 }
 0x15b   : > { %1088 = vmatmul.msk.bf16.vlgmr.msrb.gmra.mxu1 %vm569_vm2, %v688_v29 }
 0x15f   : > { %v585_v31 = vpop.f32.mrf.mxu2 }
 0x160   : > { %v586_v32 = vadd.f32 %v1224_v30, %v585_v31 }
 0x162   : > { %v589_v33 = vsel %vm569_vm2, %v586_v32, -inf }
 0x163   : > { %590 = vmax.xlane.f32.xlu0 %v589_v33 }
 0x167   : > { %v587_v34 = vpop.f32.mrf.mxu2 }
 0x1d6   : > { %v591_v35 = vpop.xlane.xlu0 %590 }
 0x1d7   : > { %v592_v36 = vsub.f32 %v586_v32, %v591_v35 }
 0x1d8   : > { %v706_v37 = vpop.f32.mrf.mxu1 }
 0x1d9   : > { %v593_v38 = vmul.f32 1.442695, %v592_v36  ;;  %v707_v39 = vadd.f32 %v1224_v30, %v706_v37 }
 0x1db   : > { %1228 = vpow2.f32 %v593_v38  ;;  %v710_v40 = vsel %vm569_vm2, %v707_v39, -inf }
 0x1dc   : > { %711 = vmax.xlane.f32.xlu2 %v710_v40 }
 0x1e0   : > { %v708_v41 = vpop.f32.mrf.mxu1 }
 0x1e1   : > { %v1229_v42 = vpop.eup %1228 }
 0x1e2   : > { %v595_v43 = vsel %vm569_vm2, %v1229_v42, 0.0 }
 0x1e3   : > { %596 = vadd.xlane.f32.xlu0 %v595_v43 }
 0x1f7   : > { %746 = vrot.lane.b32.xlu0 %v1716_v21, %s1502_s24  ;;  %s1851_s24 = sld [smem:[#allocation28_spill]] }
 0x24f   : > { %v712_v45 = vpop.xlane.xlu2 %711 }
 0x250   : > { %v713_v46 = vsub.f32 %v707_v39, %v712_v45 }
 0x252   : > { %v714_v47 = vmul.f32 1.442695, %v713_v46  ;;  %v1110_v46 = vld [vmem:[#allocation12 + $0x8] sm:$0xff] }
 0x253   : > { %858 = vmatpush.bf16.msra.mxu1 %v1110_v46 }
 0x254   : > { %1230 = vpow2.f32 %v714_v47  ;;  %v1109_v47 = vld [vmem:[#allocation12] sm:$0xff] }
 0x256   : > { %v597_v48 = vpop.xlane.xlu0 %596 }
 0x257   : > { %1232 = vrcp.f32 %v597_v48  ;;  %859 = vmatpush.bf16.msra.mxu1 %v1109_v47 }
 0x25a   : > { %v1231_v49 = vpop.eup %1230 }
 0x25b   : > { %v716_v50 = vsel %vm569_vm2, %v1231_v49, 0.0 }
 0x25c   : > { %717 = vadd.xlane.f32.xlu2 %v716_v50 }
 0x25d   : > { %v1233_v51 = vpop.eup %1232 }
 0x25e   : > { %v599_v52 = vmul.f32 %v1233_v51, %v1229_v42 }
 0x260   : > { %v600_v53 = vpack.c.bf16 %v599_v52, %v599_v52 }
 0x262   : > { %1085 = vmatmul.msk.bf16.vlgmr.msra.gmra.mxu3 %vm569_vm2, %v600_v53 }
 0x269   : > { %v747_v54 = vpop.permute.xlu0 %746 }
 0x26a   : > { %v752_v55 = vsel %vm569_vm2, %v747_v54, 0 }
 0x26b   : > { %761 = vmatpush.bf16.xpose.msra.mxu3 %v752_v55 }
 0x272   : > { %1086 = vmatmul.msk.bf16.vlgmr.msrb.gmra.mxu3 %vm569_vm2, %v631_v22 }
 0x282   : > { %1090 = vmatmul.msk.bf16.vlgmr.msra.gmra.mxu3 %vm569_vm2, %v745_v44 }
 0x2cf   : > { %v718_v15 = vpop.xlane.xlu2 %717 }
 0x2e5   : > { %v1739_v56 = vpop.f32.mrf.mxu3 }
 0x2ed   : > { %v624_v57 = vpop.f32.mrf.mxu3 }
 0x2ee   : > { %v1225_v57 = vld [vmem:[%s1818_s7] ss:$0 sm:$0xff] }
 0x2f5   : > { %v649_v58 = vpop.f32.mrf.mxu3 }
 0x2f6   : > { %v650_v59 = vadd.f32 %v1224_v30, %v649_v58 }
 0x2f8   : > { %v653_v60 = vsel %vm569_vm2, %v650_v59, -inf }
 0x2f9   : > { %654 = vmax.xlane.f32.xlu1 %v653_v60 }
 0x2fd   : > { %v651_v61 = vpop.f32.mrf.mxu3 }
 0x305   : > { %v763_v62 = vpop.f32.mrf.mxu3 }
 0x306   : > { %v764_v63 = vadd.f32 %v1224_v30, %v763_v62  ;;  %v1509_v62 = vmov 32.0  }
 0x308   : > { %v767_v0 = vsel %vm569_vm2, %v764_v63, -inf }
 0x309   : > { %768 = vmax.xlane.f32.xlu0 %v767_v0 }
 0x30d   : > { %v765_v1 = vpop.f32.mrf.mxu3 }
 0x312   : > { %665 = vrot.lane.b32.xlu1 %v1716_v21, %s1503_s27  ;;  %s920_s27 = sshll.u32 %s474_s16, 4  ;;  %s921_s27 = int_to_ptr.vmem [resolvable:$true] %s920_s27 }
 0x36c   : > { %v655_v2 = vpop.xlane.xlu1 %654 }
 0x36d   : > { %v656_v3 = vsub.f32 %v650_v59, %v655_v2 }
 0x36f   : > { %v657_v5 = vmul.f32 1.442695, %v656_v3 }
 0x371   : > { %1234 = vpow2.f32 %v657_v5 }
 0x377   : > { %v1235_v6 = vpop.eup %1234 }
 0x378   : > { %v659_v7 = vsel %vm569_vm2, %v1235_v6, 0.0 }
 0x379   : > { %660 = vadd.xlane.f32.xlu2 %v659_v7 }
 0x37c   : > { %v769_v8 = vpop.xlane.xlu0 %768 }
 0x37d   : > { %v770_v9 = vsub.f32 %v764_v63, %v769_v8 }
 0x37f   : > { %v771_v10 = vmul.f32 1.442695, %v770_v9 }
 0x381   : > { %1236 = vpow2.f32 %v771_v10 }
 0x382   : > { %1238 = vrcp.f32 %v718_v15 }
 0x384   : > { %v666_v11 = vpop.permute.xlu1 %665 }
 0x385   : > { %v671_v12 = vsel %vm609_vm3, %v666_v11, 0 }
 0x386   : > { %680 = vmatpush.bf16.msrb.mxu0 %v671_v12 }
 0x387   : > { %v1237_v13 = vpop.eup %1236 }
 0x388   : > { %v773_v14 = vsel %vm569_vm2, %v1237_v13, 0.0  ;;  %v1239_v17 = vpop.eup %1238 }
 0x389   : > { %774 = vadd.xlane.f32.xlu0 %v773_v14  ;;  %v720_v19 = vmul.f32 %v1239_v17, %v1231_v49  ;;  %v626_v49 = vpack.c.bf16 %v1739_v56, %v1739_v56 }
 0x38b   : > { %v721_v25 = vpack.c.bf16 %v720_v19, %v720_v19  ;;  %v1226_v19 = vld [vmem:[%s1819_s8] ss:$0 sm:$0xff] }
 0x391   : > { %722 = vrot.lane.b32.xlu2 %v1716_v21, %s1504_s28  ;;  %s922_s28 = sshll.u32 %s918_s30, 4  ;;  %s923_s28 = int_to_ptr.hbm [resolvable:$true] %s922_s28 }
 0x39d   : > { %779 = vrot.lane.b32.xlu0 %v1716_v21, %s1505_s26  ;;  %s907_s26 = scalar_lea.sflag [#allocation6], %s1679_s29 }
 0x3ec   : > { %v661_v16 = vpop.xlane.xlu2 %660 }
 0x3ed   : > { %1240 = vrcp.f32 %v661_v16 }
 0x3f3   : > { %v1241_v18 = vpop.eup %1240 }
 0x3f4   : > { %v663_v20 = vmul.f32 %v1241_v18, %v1235_v6  ;;  %v723_v22 = vpop.permute.xlu2 %722 }
 0x3f5   : > { %v728_v23 = vsel %vm609_vm3, %v723_v22, 0 }
 0x3f6   : > { %737 = vmatpush.bf16.msrb.mxu2 %v728_v23  ;;  %v664_v24 = vpack.c.bf16 %v663_v20, %v663_v20  ;;  %v1227_v23 = vld [vmem:[%s1851_s24] ss:$0 sm:$0xff] }
 0x3f8   : > { %1087 = vmatmul.msk.bf16.vlgmr.msrb.gmra.mxu0 %vm569_vm2, %v664_v24 }
 0x3f9   : > { %1089 = vmatmul.msk.bf16.vlgmr.msrb.gmra.mxu2 %vm569_vm2, %v721_v25 }
 0x3fc   : > { %v775_v26 = vpop.xlane.xlu0 %774 }
 0x3fd   : > { %1242 = vrcp.f32 %v775_v26 }
 0x3fe   : > { %1244 = vrcp.f32 %v1509_v62 }
 0x403   : > { %v1243_v21 = vpop.eup %1242 }
 0x404   : > { %v777_v27 = vmul.f32 %v1243_v21, %v1237_v13  ;;  %v1245_v63 = vpop.eup %1244 }
 0x405   : > { %v870_v0 = vmul.f32 32.0, %v1245_v63  ;;  %vm874_vm7 = vweird.f32 %v1245_v63 }
 0x406   : > { %v778_v30 = vpack.c.bf16 %v777_v27, %v777_v27 }
 0x407   : > { %v871_v1 = vsub.f32 1.0, %v870_v0 }
 0x409   : > { %v872_v2 = vmul.f32 %v1245_v63, %v871_v1 }
 0x40b   : > { %v873_v3 = vadd.f32 %v1245_v63, %v872_v2 }
 0x40d   : > { %v875_v5 = vsel %vm874_vm7, %v1245_v63, %v873_v3 }
 0x40f   : > { %v780_v28 = vpop.permute.xlu0 %779 }
 0x410   : > { %v785_v29 = vsel %vm609_vm3, %v780_v28, 0 }
 0x411   : > { %794 = vmatpush.bf16.msra.mxu0 %v785_v29 }
 0x414   : > { %1091 = vmatmul.msk.bf16.vlgmr.msra.gmra.mxu0 %vm569_vm2, %v778_v30 }
 0x475   : > { %v682_v31 = vpop.f32.mrf.mxu0 }
 0x476   : > { %v686_v32 = vpack.c.bf16 %v682_v31, %v682_v31 }
 0x478   : > { %v802_v33 = vunpack.c.l.b16 %v686_v32 }
 0x47a   : > { %v803_v34 = vpack.c.b16 %v802_v33, %v802_v33 }
 0x47c   : > { %v739_v35 = vpop.f32.mrf.mxu2  ;;  %804 = vrot.lane.b32.xlu1 %v803_v34, %s1506_s22  ;;  %s1412_s22 = sshra.s32 %s923_s28, 4  ;;  %s1413_s22 = int_to_ptr.hbm [resolvable:$true] %s1412_s22 }
 0x47d   : > { %v743_v36 = vpack.c.bf16 %v739_v35, %v739_v35  ;;  %v684_v37 = vpop.f32.mrf.mxu0  ;;  %p1419_p10 = scmp.lt.s32.totalorder %s1413_s22, %s1849_s2 }
 0x47f   : > { %v807_v38 = vunpack.c.l.b16 %v743_v36 }
 0x481   : > { %v808_v39 = vpack.c.b16 %v807_v38, %v807_v38 }
 0x484   : > { %v741_v40 = vpop.f32.mrf.mxu2  ;;  %809 = vrot.lane.b32.xlu1 %v808_v39, %s1507_s12  ;;  %s1414_s12 = scalar_lea.hbm %s1413_s22, 8 }
 0x485   : > { %p1415_p1 = scmp.ne.s32.totalorder %s1413_s22, %s1414_s12  ;;  %p1420_p11 = scmp.lt.s32.totalorder %s1418_s6, %s1414_s12 }
 0x487   : > { %p1416_p3 = pnand %p1415_p1, %p1652_p4  ;;  %p1421_p12 = por %p1420_p11, %p1419_p10 }
 0x489   : > { %p1417_p9 = pneg %p1416_p3 }
 0x48b   : > { %p1422_p13 = pnand %p1421_p12, %p1417_p9 }
 0x491   : > { %v796_v41 = vpop.f32.mrf.mxu0 }
 0x492   : > { %v800_v42 = vpack.c.bf16 %v796_v41, %v796_v41 }
 0x494   : > { %v812_v43 = vunpack.c.l.b16 %v800_v42 }
 0x496   : > { %v813_v44 = vpack.c.b16 %v812_v43, %v812_v43 }
 0x498   : > { %814 = vrot.lane.b32.xlu2 %v813_v44, %s1508_s4 }
 0x499   : > { %v798_v45 = vpop.f32.mrf.mxu0 }
 0x4ee   : > { %v805_v48 = vpop.permute.xlu1 %804 }
 0x4ef   : > { %v818_v50 = vsel %vm569_vm2, %v626_v49, %v805_v48 }
 0x4f2   : > { %v815_v52 = vpop.permute.xlu2 %814 }
 0x4f6   : > { %v810_v51 = vpop.permute.xlu1 %809 }
 0x4f7   : > { %v821_v53 = vsel %vm819_vm4, %v818_v50, %v810_v51 }
 0x4f8   : > { %v824_v54 = vsel %vm822_vm5, %v821_v53, %v815_v52 }
 0x4f9   : > { %827 = vst.msk [vmem:[#allocation3] sm:$0xf] %vm826_vm6, %v824_v54 }
 0x500   : > { %v828_v55 = vld [vmem:[#allocation3] sm:$0xf] }
 0x501   : > { %1100 = vmatmul.msk.bf16.vlgmr.msra.gmra.mxu1 %vm502_vm0, %v828_v55 }
 0x57e   : > { %v861_v58 = vpop.f32.mrf.mxu1 }
 0x57f   : > { %v862_v59 = vadd.f32 %v1225_v57, %v861_v58 }
 0x581   : > { %v865_v56 = vadd.f32 %v862_v59, %v1703_v4 }
 0x583   : > { %v866_v60 = vsel %vm502_vm0, %v865_v56, 0.0 }
 0x584   : > { %867 = vadd.xlane.f32.xlu0 %v866_v60 }
 0x586   : > { %v863_v61 = vpop.f32.mrf.mxu1 }
 0x5f7   : > { %v868_v6 = vpop.xlane.xlu0 %867 }
 0x5f8   : > { %v876_v7 = vmul.f32 %v875_v5, %v868_v6 }
 0x5fa   : > { %v877_v8 = vsub.f32 %v865_v56, %v876_v7 }
 0x5fc   : > { %v878_v9 = vmul.f32 %v877_v8, %v877_v8 }
 0x5fe   : > { %v879_v4 = vsel %vm502_vm0, %v878_v9, 0.0 }
 0x5ff   : > { %880 = vadd.xlane.f32.xlu1 %v879_v4 }
 0x672   : > { %v881_v10 = vpop.xlane.xlu1 %880 }
 0x673   : > { %v882_v11 = vmul.f32 %v881_v10, %v875_v5 }
 0x675   : > { %v883_v12 = vadd.f32 1e-12, %v882_v11 }
 0x677   : > { %1246 = vrsqrt.f32 %v883_v12  ;;  %vm890_vm9 = vweird.f32 %v883_v12 }
 0x67d   : > { %v1247_v13 = vpop.eup %1246 }
 0x67e   : > { %v885_v14 = vmul.f32 %v1247_v13, %v883_v12  ;;  %vm891_vm8 = vweird.f32 %v1247_v13 }
 0x67f   : > { %vm892_vm10 = vmor %vm890_vm9, %vm891_vm8 }
 0x680   : > { %v886_v15 = vmul.f32 %v1247_v13, %v885_v14 }
 0x682   : > { %v887_v16 = vmul.f32 0.5, %v886_v15 }
 0x684   : > { %v888_v17 = vsub.f32 1.5, %v887_v16 }
 0x686   : > { %v889_v18 = vmul.f32 %v1247_v13, %v888_v17 }
 0x688   : > { %v893_v20 = vsel %vm892_vm10, %v1247_v13, %v889_v18 }
 0x689   : > { %v894_v22 = vmul.f32 %v893_v20, %v877_v8 }
 0x68b   : > { %v899_v24 = vmul.f32 %v1226_v19, %v894_v22 }
 0x68d   : > { %v904_v25 = vadd.f32 %v1227_v23, %v899_v24 }
 0x68f   : > { %905 = vst.msk [vmem:[%s474_s16] sm:$0xff] %vm502_vm0, %v904_v25 }
 0x690   : > { %1425 = shalt.err (!%p1422_p13)
}
 0x691   : > { %1127 = dma.vmem_to_hbm [thread:$0]  (%p1652_p4), %s921_s27, 128, %s923_s28, %s907_s26  }
 0x692 PF: > { %s1852_s29 = sld [smem:[#allocation19_spill]]  ;;  %p1147_p0 = pnand %p1057_p6, %p1660_p7 }
 0x694   : > { %p1148_p2 = pneg %p1147_p0 }
 0x698   : > { %s934_s23 = sand.u32 1, %s1852_s29  }
 0x699   : > { %s935_s19 = scalar_lea.sflag [#allocation6], %s934_s23 }
 0x69a   : > { %1467 = dma.done.wait (%p1148_p2), %s935_s19, 128  }
 0x69b   : > { %1469 = vsyncadd (%p1148_p2), %s935_s19, 4294967168  ;;  %s30_s18 = sadd.s32 1, %s1492_s18   ;;  %s1854_s25 = sld [smem:[#allocation20_spill]] }
 0x69c   : > { %p27_p5 = scmp.ge.s32.totalorder %s30_s18, 4   ;;  %s1855_s15 = sld [smem:[#allocation23_spill]] }
 0x69d   : > { %s1856_s30 = sld [smem:[#allocation21_spill]]  ;;  %s1857_s13 = smov %s1476_s14 }
 0x69e   : > { %s1859_s16 = smov %s1488_s17 }
 0x69f   :  { %29 = sbr.rel (!%p27_p5) target bundleno = 15 (0xf), region = 135 }
 0x6a1   : > { %s1858_s14 = smov %s1854_s25 }
 0x6a3   : > { %s1860_s17 = smov %s1856_s30 }
 0x6a4   :  { %941 = vsyncpa [#allocation5], 1 }
 0x6a5   :  { %943 = vsyncpa [#allocation5 + $0x1], 1 }
 0x6a6   :  { %944 = vsyncpa [#allocation8], 1 }
 0x6a7   :  { %946 = vsyncpa [#allocation8 + $0x1], 1 }
 0x6a8   :  { %947 = vsyncpa [#allocation11], 1 }
 0x6a9   :  { %948 = vsyncpa [#allocation6], 1 }
 0x6aa   :  { %950 = vsyncpa [#allocation6 + $0x1], 1 }

</bundles_post_ra>
